<compile_context>
chip_gen: v7x
topology: tpu7x:2x2x1
jax: 0.10.0
libtpu: 0.0.40
codegen_flags: <defaults>
</compile_context>

<pallas_src>
import functools

import jax
import jax.numpy as jnp
from jax.experimental import pallas as pl
from jax.experimental.pallas import tpu as pltpu

HIDDEN = 128       # hidden_dim (module default; lane-dense)
DENSE = 128        # dense_dim  (module default; lane-dense)
BN_EPS = 1e-5
_VMEM_LIMIT = 32 * 1024 * 1024   # explicit scoped-VMEM cap (safe on v5e/v6e/v7x)


# ----------------------------------------------------------------------------
# In-kernel helpers
# ----------------------------------------------------------------------------
def _dot(a, w_ref):
    """MXU matmul: bf16 inputs, f32 accumulation."""
    return jnp.dot(a.astype(jnp.bfloat16), w_ref[...],
                   preferred_element_type=jnp.float32)


def _mask_pad_rows(h, n_valid):
    """Zero rows of the current tile that are padding (skip if none exist)."""
    tile = h.shape[0]
    if n_valid % tile == 0:            # rows tile evenly -> no padding anywhere
        return h
    row = pl.program_id(0) * tile + jax.lax.broadcasted_iota(jnp.int32, (tile, 1), 0)
    return jnp.where(row < n_valid, h, 0.0)


def _store_and_stats(h, out_ref, sum_ref, sq_ref, n_valid):
    """Store h (bf16) and accumulate per-feature sum / sum-sq of the stored values."""
    hb = h.astype(out_ref.dtype)                  # bf16 intermediate store
    out_ref[...] = hb
    hs = _mask_pad_rows(hb.astype(jnp.float32), n_valid)

    @pl.when(pl.program_id(0) == 0)
    def _():
        sum_ref[...] = jnp.zeros_like(sum_ref)
        sq_ref[...] = jnp.zeros_like(sq_ref)

    sum_ref[...] += jnp.sum(hs, axis=0, keepdims=True)
    sq_ref[...] += jnp.sum(hs * hs, axis=0, keepdims=True)


# ----------------------------------------------------------------------------
# Stage kernels (one row tile per grid step)
# ----------------------------------------------------------------------------
def _mm_stats_kernel(n_valid, x_ref, w_ref, h_ref, sum_ref, sq_ref):
    # h = x @ W ; accumulate stats(h)                     (x already bf16)
    _store_and_stats(_dot(x_ref[...], w_ref), h_ref, sum_ref, sq_ref, n_valid)


def _bn_mm_stats_kernel(n_valid, h_ref, scale_ref, shift_ref, w_ref,
                        out_ref, sum_ref, sq_ref):
    # a = relu(BN(h_prev)) ; h = a @ W ; accumulate stats(h)
    a = jnp.maximum(h_ref[...].astype(jnp.float32) * scale_ref[...] + shift_ref[...],
                    0.0)
    _store_and_stats(_dot(a, w_ref), out_ref, sum_ref, sq_ref, n_valid)


def _bn_res_mm_stats_kernel(n_valid, h_ref, res_ref, scale_ref, shift_ref, w_ref,
                            eps_ref, out_ref, sum_ref, sq_ref):
    # a = relu(BN(h_prev)) ; pre = (1+eps)*res + a ; h = pre @ W ; stats(h)
    a = jnp.maximum(h_ref[...].astype(jnp.float32) * scale_ref[...] + shift_ref[...],
                    0.0)
    pre = (1.0 + eps_ref[0, 0]) * res_ref[...] + a
    _store_and_stats(_dot(pre, w_ref), out_ref, sum_ref, sq_ref, n_valid)


def _node_pre_mm_stats_kernel(n_valid, x_ref, agg_ref, deg_ref, w_ref, eps_ref,
                              out_ref, sum_ref, sq_ref):
    # pre = (1+eps)*x + (agg - x*deg) ; h = pre @ W ; stats(h)
    x = x_ref[...]
    pre = (1.0 + eps_ref[0, 0]) * x + agg_ref[...] - x * deg_ref[...]
    _store_and_stats(_dot(pre, w_ref), out_ref, sum_ref, sq_ref, n_valid)


def _bn_relu_kernel(h_ref, scale_ref, shift_ref, out_ref):
    # Final normalize + ReLU (no downstream stats needed).
    out_ref[...] = jnp.maximum(
        h_ref[...].astype(jnp.float32) * scale_ref[...] + shift_ref[...], 0.0)


# ----------------------------------------------------------------------------
# pallas_call stage runner
# ----------------------------------------------------------------------------
def _stage(kernel, tiled, resident, smem, out_feat, *, rows_pad, tile,
           stats_feat=None, parallel=False, out_dtype=jnp.float32):
    """One pipelined pass over the row axis.

    tiled    : arrays tiled (tile, feat) along rows (double-buffered DMA).
    resident : small arrays (weights, BN scale/shift) kept resident in VMEM.
    smem     : (1, 1) scalar parameters placed in SMEM.
    """
    in_specs = (
        [pl.BlockSpec((tile, a.shape[1]), lambda i: (i, 0)) for a in tiled]
        + [pl.BlockSpec(a.shape, lambda i: (0, 0)) for a in resident]
        + [pl.BlockSpec(memory_space=pltpu.MemorySpace.SMEM) for _ in smem]
    )
    out_shape = [jax.ShapeDtypeStruct((rows_pad, out_feat), out_dtype)]
    out_specs = [pl.BlockSpec((tile, out_feat), lambda i: (i, 0))]
    if stats_feat is not None:
        out_shape += [jax.ShapeDtypeStruct((1, stats_feat), jnp.float32)] * 2
        out_specs += [pl.BlockSpec((1, stats_feat), lambda i: (0, 0))] * 2
    multi = stats_feat is not None
    return pl.pallas_call(
        kernel,
        grid=(rows_pad // tile,),
        in_specs=in_specs,
        out_specs=tuple(out_specs) if multi else out_specs[0],
        out_shape=tuple(out_shape) if multi else out_shape[0],
        compiler_params=pltpu.CompilerParams(
            # Stats outputs are revisited every grid step -> "arbitrary";
            # pure element-wise stages can run "parallel" (v7x megacore).
            dimension_semantics=("parallel" if parallel else "arbitrary",),
            vmem_limit_bytes=_VMEM_LIMIT),
    )(*tiled, *resident, *smem)


def _bn_affine(s, sq, n, gamma, beta):
    """Fold training-mode BatchNorm1d into a single scale/shift FMA."""
    mean = s / n
    var = jnp.maximum(sq / n - mean * mean, 0.0)       # biased batch variance
    scale = gamma * jax.lax.rsqrt(var + BN_EPS)
    shift = beta - mean * scale
    return scale, shift


def _tiling(rows, max_tile):
    # Multiples of 16 so bf16 tiles are natively (16, 128)-packed.
    max_tile = max(16, (max_tile // 16) * 16)
    tile = min(max_tile, ((rows + 15) // 16) * 16)
    rows_pad = ((rows + tile - 1) // tile) * tile
    return tile, rows_pad


def _pad_rows(a, rows_pad):
    pad = rows_pad - a.shape[0]
    return a if pad == 0 else jnp.pad(a, ((0, pad), (0, 0)))


# ----------------------------------------------------------------------------
# Full NodeEdge forward (graph glue in XLA, MLP hot path in Pallas)
# ----------------------------------------------------------------------------
def node_edge_forward(x, edge_index, edge_attr, degree, params, *, tile_rows=1024):
    N, _ = x.shape
    E = edge_attr.shape[0]
    src, dst = edge_index[0], edge_index[1]

    # bf16 copies of the Linear weights for the MXU (elementwise math stays f32).
    wk = {k: params[k].astype(jnp.bfloat16) for k in ("w1", "w2", "w3", "w4")}

    # gather_from_ptensors(x, G, edge): each edge sums its endpoint features.
    # TODO(synk): data-dependent gather stays in XLA; for very large E it could
    # be fused into the first stage with PrefetchScalarGridSpec row gathers.
    node2edge = x[src] + x[dst]
    # gather_from_ptensors(edge_attr, G, edge): modelled as identity (GINE).
    edge2edge = edge_attr
    # Matmul-only input -> pre-cast to bf16 (halves its HBM read / DMA traffic;
    # numerically identical to the in-kernel MXU cast).
    cat_in = jnp.concatenate([edge2edge, node2edge], axis=-1).astype(jnp.bfloat16)

    # ---------------- edge path: edge_mlp_1 then edge_mlp_2 ------------------
    tile_e, e_pad = _tiling(E, tile_rows)
    cat_p = _pad_rows(cat_in, e_pad)                                   # (E, 2H) bf16
    e2e_p = _pad_rows(edge2edge, e_pad)                                # (E, H) f32

    h1, s1, q1 = _stage(functools.partial(_mm_stats_kernel, E),
                        [cat_p], [wk["w1"]], [], DENSE,
                        rows_pad=e_pad, tile=tile_e, stats_feat=DENSE,
                        out_dtype=jnp.bfloat16)
    sc1, sh1 = _bn_affine(s1, q1, E, params["g1"], params["be1"])

    h2, s2, q2 = _stage(functools.partial(_bn_mm_stats_kernel, E),
                        [h1], [sc1, sh1, wk["w2"]], [], HIDDEN,
                        rows_pad=e_pad, tile=tile_e, stats_feat=HIDDEN,
                        out_dtype=jnp.bfloat16)
    sc2, sh2 = _bn_affine(s2, q2, E, params["g2"], params["be2"])

    h3, s3, q3 = _stage(functools.partial(_bn_res_mm_stats_kernel, E),
                        [h2, e2e_p], [sc2, sh2, wk["w3"]], [params["eps_edge"]],
                        DENSE, rows_pad=e_pad, tile=tile_e, stats_feat=DENSE,
                        out_dtype=jnp.bfloat16)
    sc3, sh3 = _bn_affine(s3, q3, E, params["g3"], params["be3"])

    h4, s4, q4 = _stage(functools.partial(_bn_mm_stats_kernel, E),
                        [h3], [sc3, sh3, wk["w4"]], [], HIDDEN,
                        rows_pad=e_pad, tile=tile_e, stats_feat=HIDDEN,
                        out_dtype=jnp.bfloat16)
    sc4, sh4 = _bn_affine(s4, q4, E, params["g4"], params["be4"])

    edge_out = _stage(_bn_relu_kernel, [h4], [sc4, sh4], [], HIDDEN,
                      rows_pad=e_pad, tile=tile_e, parallel=True)[:E]

    # gather_from_ptensors(edge_out, G, node): sum over incident edges (XLA scatter).
    agg = jnp.zeros_like(x).at[src].add(edge_out).at[dst].add(edge_out)

    # ---------------- node path: node_mlp (shares weights with edge_mlp_2) ---
    tile_n, n_pad = _tiling(N, tile_rows)
    x_p = _pad_rows(x, n_pad)
    agg_p = _pad_rows(agg, n_pad)
    deg_p = _pad_rows(degree, n_pad)

    h5, s5, q5 = _stage(functools.partial(_node_pre_mm_stats_kernel, N),
                        [x_p, agg_p, deg_p], [wk["w3"]], [params["eps_node"]],
                        DENSE, rows_pad=n_pad, tile=tile_n, stats_feat=DENSE,
                        out_dtype=jnp.bfloat16)
    sc5, sh5 = _bn_affine(s5, q5, N, params["g3"], params["be3"])

    h6, s6, q6 = _stage(functools.partial(_bn_mm_stats_kernel, N),
                        [h5], [sc5, sh5, wk["w4"]], [], HIDDEN,
                        rows_pad=n_pad, tile=tile_n, stats_feat=HIDDEN,
                        out_dtype=jnp.bfloat16)
    sc6, sh6 = _bn_affine(s6, q6, N, params["g4"], params["be4"])

    node_out = _stage(_bn_relu_kernel, [h6], [sc6, sh6], [], HIDDEN,
                      rows_pad=n_pad, tile=tile_n, parallel=True)[:N]

    return node_out, edge_out


# ----------------------------------------------------------------------------
# Pure-JAX reference with the same numerics (bf16 MXU inputs, bf16 intermediate
# activations, f32 BN math)
# ----------------------------------------------------------------------------
def _reference_forward(x, edge_index, edge_attr, degree, p):
    def dot(a, w):
        return jnp.dot(a.astype(jnp.bfloat16), w.astype(jnp.bfloat16),
                       preferred_element_type=jnp.float32)

    def rnd(h):  # kernels store pre-BN intermediates in bf16
        return h.astype(jnp.bfloat16).astype(jnp.float32)

    def bn_relu(h, gamma, beta, n):
        mean = jnp.sum(h, axis=0, keepdims=True) / n
        var = jnp.maximum(jnp.sum(h * h, axis=0, keepdims=True) / n - mean * mean, 0.0)
        scale = gamma * jax.lax.rsqrt(var + BN_EPS)
        return jnp.maximum(h * scale + (beta - mean * scale), 0.0)

    src, dst = edge_index[0], edge_index[1]
    E, N = edge_attr.shape[0], x.shape[0]
    n2e = x[src] + x[dst]
    cat_in = jnp.concatenate([edge_attr, n2e], axis=-1)
    h = bn_relu(rnd(dot(cat_in, p["w1"])), p["g1"], p["be1"], E)
    h = bn_relu(rnd(dot(h, p["w2"])), p["g2"], p["be2"], E)
    pre = (1.0 + p["eps_edge"][0, 0]) * edge_attr + h
    h = bn_relu(rnd(dot(pre, p["w3"])), p["g3"], p["be3"], E)
    edge_out = bn_relu(rnd(dot(h, p["w4"])), p["g4"], p["be4"], E)
    agg = jnp.zeros_like(x).at[src].add(edge_out).at[dst].add(edge_out)
    pre = (1.0 + p["eps_node"][0, 0]) * x + agg - x * degree
    h = bn_relu(rnd(dot(pre, p["w3"])), p["g3"], p["be3"], N)
    node_out = bn_relu(rnd(dot(h, p["w4"])), p["g4"], p["be4"], N)
    return node_out, edge_out


def _init_params(key, hidden=HIDDEN, dense=DENSE):
    ks = jax.random.split(key, 12)

    def lin(k, fan_in, fan_out):
        # Weight only: a bias feeding a training-mode BatchNorm is cancelled
        # exactly by the mean subtraction, so it is dropped.
        return jax.random.normal(k, (fan_in, fan_out), jnp.float32) / jnp.sqrt(fan_in)

    def bn(kg, kb, feat):
        gamma = 1.0 + 0.1 * jax.random.normal(kg, (1, feat), jnp.float32)
        beta = 0.1 * jax.random.normal(kb, (1, feat), jnp.float32)
        return gamma, beta

    # edge_mlp_1: Linear(2H->D) + BN(D) + ReLU + Linear(D->H) + BN(H) + ReLU.
    w1 = lin(ks[0], 2 * hidden, dense)      # fused [edge2edge | node2edge] weight
    w2 = lin(ks[1], dense, hidden)
    # nn (node_mlp) == edge_mlp_2 (deepcopy at init -> identical weights):
    # Linear(H->D) + BN(D) + ReLU + Linear(D->H) + BN(H) + ReLU.
    w3 = lin(ks[2], hidden, dense)
    w4 = lin(ks[3], dense, hidden)
    g1, be1 = bn(ks[4], ks[5], dense)
    g2, be2 = bn(ks[6], ks[7], hidden)
    g3, be3 = bn(ks[8], ks[9], dense)
    g4, be4 = bn(ks[10], ks[11], hidden)
    return {
        "w1": w1, "g1": g1, "be1": be1,
        "w2": w2, "g2": g2, "be2": be2,
        "w3": w3, "g3": g3, "be3": be3,
        "w4": w4, "g4": g4, "be4": be4,
        # Trainable eps (module default init 0.0); nonzero here so the
        # (1 + eps) scaling paths are actually exercised.
        "eps_edge": jnp.full((1, 1), 0.25, jnp.float32),
        "eps_node": jnp.full((1, 1), -0.125, jnp.float32),
    }


if __name__ == "__main__":
    N = 200                      # nodes; ring graph -> E = 200 edges
    H = HIDDEN
    key = jax.random.PRNGKey(0)
    k_x, k_e, k_p = jax.random.split(key, 3)

    # Ring graph: N undirected edges (i, i+1 mod N); every node has degree 2.
    src = jnp.arange(N, dtype=jnp.int32)
    dst = (src + 1) % N
    edge_index = jnp.stack([src, dst], axis=0)            # [2, E]
    E = edge_index.shape[1]

    x = jax.random.normal(k_x, (N, H), jnp.float32)
    edge_attr = jax.random.normal(k_e, (E, H), jnp.float32)
    degree = (jnp.zeros((N, 1), jnp.float32)
              .at[src, 0].add(1.0).at[dst, 0].add(1.0))   # data.degree.view(-1, 1)

    params = _init_params(k_p)

    # tile_rows=64 so this 200-row example exercises multi-tile pipelining and
    # the padded-row masking of the BN statistics (200 rows -> 4 tiles of 64).
    fwd = jax.jit(functools.partial(node_edge_forward, tile_rows=64))
    node_out, edge_out = fwd(x, edge_index, edge_attr, degree, params)
    node_out = jax.block_until_ready(node_out)
    edge_out = jax.block_until_ready(edge_out)

    node_ref, edge_ref = _reference_forward(x, edge_index, edge_attr, degree, params)

    assert node_out.shape == (N, H) and edge_out.shape == (E, H)
    # Both sides use bf16 MXU inputs and bf16 intermediates; the residual
    # difference comes from the tiled vs. whole-column f32 accumulation order
    # of the BN statistics.
    assert jnp.allclose(edge_out, edge_ref, atol=3e-2, rtol=3e-2), \
        float(jnp.max(jnp.abs(edge_out - edge_ref)))
    assert jnp.allclose(node_out, node_ref, atol=3e-2, rtol=3e-2), \
        float(jnp.max(jnp.abs(node_out - node_ref)))

    print("KERNEL_OK")
</pallas_src>

<mosaic_0001>
module attributes {stable_mosaic.version = 11 : i64} {
  func.func @_mm_stats_kernel(%arg0: i32, %arg1: memref<64x256xbf16, #tpu.memory_space<vmem>>, %arg2: memref<256x128xbf16, #tpu.memory_space<vmem>>, %arg3: memref<64x128xbf16, #tpu.memory_space<vmem>>, %arg4: memref<1x128xf32, #tpu.memory_space<vmem>>, %arg5: memref<1x128xf32, #tpu.memory_space<vmem>>) attributes {dimension_semantics = [#tpu.dimension_semantics<arbitrary>], iteration_bounds = array<i64: 4>, scalar_prefetch = 0 : i64, scratch_operands = 0 : i64, tpu.core_type = #tpu.core_type<tc>, window_params = [{transform_indices = @transform_0, window_bounds = array<i64: 64, 256>}, {pipeline_mode = #tpu.pipeline_mode<synchronous>, transform_indices = @transform_1, window_bounds = array<i64: 256, 128>}, {transform_indices = @transform_2, window_bounds = array<i64: 64, 128>}, {pipeline_mode = #tpu.pipeline_mode<synchronous>, transform_indices = @transform_3, window_bounds = array<i64: 1, 128>}, {pipeline_mode = #tpu.pipeline_mode<synchronous>, transform_indices = @transform_4, window_bounds = array<i64: 1, 128>}]} {
    %c0 = arith.constant 0 : index
    %c0_0 = arith.constant 0 : index
    %0 = vector.load %arg1[%c0, %c0_0] : memref<64x256xbf16, #tpu.memory_space<vmem>>, vector<64x256xbf16>
    %c0_1 = arith.constant 0 : index
    %c0_2 = arith.constant 0 : index
    %1 = vector.load %arg2[%c0_1, %c0_2] : memref<256x128xbf16, #tpu.memory_space<vmem>>, vector<256x128xbf16>
    %cst = arith.constant dense<0.000000e+00> : vector<64x128xf32>
    %2 = tpu.matmul %0, %1, %cst {dimension_numbers = #tpu.dot_dimension_numbers<[1], [0], [0], [1], [0, 0, 1, 1], [], []>} : vector<64x256xbf16>, vector<256x128xbf16>, vector<64x128xf32> -> vector<64x128xf32>
    %3 = arith.truncf %2 : vector<64x128xf32> to vector<64x128xbf16>
    %c0_3 = arith.constant 0 : index
    %c0_4 = arith.constant 0 : index
    %4 = vector.load %arg3[%c0_3, %c0_4] : memref<64x128xbf16, #tpu.memory_space<vmem>>, vector<64x128xbf16>
    tpu.vector_store %arg3[%c0_3, %c0_4], %3 {strides = array<i32>} : memref<64x128xbf16, #tpu.memory_space<vmem>>, vector<64x128xbf16>,
    %5 = arith.extf %3 : vector<64x128xbf16> to vector<64x128xf32>
    %c64_i32 = arith.constant 64 : i32
    %6 = arith.muli %arg0, %c64_i32 : i32
    %7 = tpu.iota {dimensions = array<i32: 0>} : vector<64x1xi32>
    %8 = vector.broadcast %6 : i32 to vector<64x1xi32>
    %9 = arith.addi %8, %7 : vector<64x1xi32>
    %c200_i32 = arith.constant 200 : i32
    %10 = vector.broadcast %c200_i32 : i32 to vector<64x1xi32>
    %11 = arith.cmpi slt, %9, %10 : vector<64x1xi32>
    %cst_5 = arith.constant 0.000000e+00 : f32
    %12 = vector.shape_cast %11 : vector<64x1xi1> to vector<64x1xi1>
    %13 = vector.broadcast %12 : vector<64x1xi1> to vector<64x128xi1>
    %14 = vector.broadcast %cst_5 : f32 to vector<64x128xf32>
    %15 = arith.select %13, %5, %14 : vector<64x128xi1>, vector<64x128xf32>
    %c0_i32 = arith.constant 0 : i32
    %16 = arith.cmpi eq, %arg0, %c0_i32 : i32
    %17 = arith.extui %16 : i1 to i32
    %c0_i32_6 = arith.constant 0 : i32
    %18 = arith.cmpi ne, %17, %c0_i32_6 : i32
    scf.if %18 {
      %cst_17 = arith.constant 0.000000e+00 : f32
      %30 = vector.broadcast %cst_17 : f32 to vector<1x128xf32>
      %c0_18 = arith.constant 0 : index
      %c0_19 = arith.constant 0 : index
      %31 = vector.load %arg4[%c0_18, %c0_19] : memref<1x128xf32, #tpu.memory_space<vmem>>, vector<1x128xf32>
      tpu.vector_store %arg4[%c0_18, %c0_19], %30 {strides = array<i32>} : memref<1x128xf32, #tpu.memory_space<vmem>>, vector<1x128xf32>,
      %cst_20 = arith.constant 0.000000e+00 : f32
      %32 = vector.broadcast %cst_20 : f32 to vector<1x128xf32>
      %c0_21 = arith.constant 0 : index
      %c0_22 = arith.constant 0 : index
      %33 = vector.load %arg5[%c0_21, %c0_22] : memref<1x128xf32, #tpu.memory_space<vmem>>, vector<1x128xf32>
      tpu.vector_store %arg5[%c0_21, %c0_22], %32 {strides = array<i32>} : memref<1x128xf32, #tpu.memory_space<vmem>>, vector<1x128xf32>,
    } else {
    }
    %c0_7 = arith.constant 0 : index
    %c0_8 = arith.constant 0 : index
    %19 = vector.load %arg4[%c0_7, %c0_8] : memref<1x128xf32, #tpu.memory_space<vmem>>, vector<1x128xf32>
    %cst_9 = arith.constant dense<0.000000e+00> : vector<128xf32>
    %20 = vector.multi_reduction <add>, %15, %cst_9 [0] : vector<64x128xf32> to vector<128xf32>
    %21 = vector.shape_cast %20 : vector<128xf32> to vector<1x128xf32>
    %22 = arith.addf %19, %21 : vector<1x128xf32>
    %c0_10 = arith.constant 0 : index
    %c0_11 = arith.constant 0 : index
    %23 = vector.load %arg4[%c0_10, %c0_11] : memref<1x128xf32, #tpu.memory_space<vmem>>, vector<1x128xf32>
    tpu.vector_store %arg4[%c0_10, %c0_11], %22 {strides = array<i32>} : memref<1x128xf32, #tpu.memory_space<vmem>>, vector<1x128xf32>,
    %c0_12 = arith.constant 0 : index
    %c0_13 = arith.constant 0 : index
    %24 = vector.load %arg5[%c0_12, %c0_13] : memref<1x128xf32, #tpu.memory_space<vmem>>, vector<1x128xf32>
    %25 = arith.mulf %15, %15 : vector<64x128xf32>
    %cst_14 = arith.constant dense<0.000000e+00> : vector<128xf32>
    %26 = vector.multi_reduction <add>, %25, %cst_14 [0] : vector<64x128xf32> to vector<128xf32>
    %27 = vector.shape_cast %26 : vector<128xf32> to vector<1x128xf32>
    %28 = arith.addf %24, %27 : vector<1x128xf32>
    %c0_15 = arith.constant 0 : index
    %c0_16 = arith.constant 0 : index
    %29 = vector.load %arg5[%c0_15, %c0_16] : memref<1x128xf32, #tpu.memory_space<vmem>>, vector<1x128xf32>
    tpu.vector_store %arg5[%c0_15, %c0_16], %28 {strides = array<i32>} : memref<1x128xf32, #tpu.memory_space<vmem>>, vector<1x128xf32>,
    return
  }
  func.func @transform_0(%arg0: i32) -> (i32, i32) {
    %c0_i32 = arith.constant 0 : i32
    %c0_i32_0 = arith.constant 0 : i32
    return %arg0, %c0_i32 : i32, i32
  }
  func.func @transform_1(%arg0: i32) -> (i32, i32) {
    %c0_i32 = arith.constant 0 : i32
    %c0_i32_0 = arith.constant 0 : i32
    %c0_i32_1 = arith.constant 0 : i32
    return %c0_i32, %c0_i32_0 : i32, i32
  }
  func.func @transform_2(%arg0: i32) -> (i32, i32) {
    %c0_i32 = arith.constant 0 : i32
    %c0_i32_0 = arith.constant 0 : i32
    return %arg0, %c0_i32 : i32, i32
  }
  func.func @transform_3(%arg0: i32) -> (i32, i32) {
    %c0_i32 = arith.constant 0 : i32
    %c0_i32_0 = arith.constant 0 : i32
    %c0_i32_1 = arith.constant 0 : i32
    return %c0_i32, %c0_i32_0 : i32, i32
  }
  func.func @transform_4(%arg0: i32) -> (i32, i32) {
    %c0_i32 = arith.constant 0 : i32
    %c0_i32_0 = arith.constant 0 : i32
    %c0_i32_1 = arith.constant 0 : i32
    return %c0_i32, %c0_i32_0 : i32, i32
  }
}

module attributes {stable_mosaic.version = 11 : i64} {
  func.func @_bn_mm_stats_kernel(%arg0: i32, %arg1: memref<64x128xbf16, #tpu.memory_space<vmem>>, %arg2: memref<1x128xf32, #tpu.memory_space<vmem>>, %arg3: memref<1x128xf32, #tpu.memory_space<vmem>>, %arg4: memref<128x128xbf16, #tpu.memory_space<vmem>>, %arg5: memref<64x128xbf16, #tpu.memory_space<vmem>>, %arg6: memref<1x128xf32, #tpu.memory_space<vmem>>, %arg7: memref<1x128xf32, #tpu.memory_space<vmem>>) attributes {dimension_semantics = [#tpu.dimension_semantics<arbitrary>], iteration_bounds = array<i64: 4>, scalar_prefetch = 0 : i64, scratch_operands = 0 : i64, tpu.core_type = #tpu.core_type<tc>, window_params = [{transform_indices = @transform_0, window_bounds = array<i64: 64, 128>}, {pipeline_mode = #tpu.pipeline_mode<synchronous>, transform_indices = @transform_1, window_bounds = array<i64: 1, 128>}, {pipeline_mode = #tpu.pipeline_mode<synchronous>, transform_indices = @transform_2, window_bounds = array<i64: 1, 128>}, {pipeline_mode = #tpu.pipeline_mode<synchronous>, transform_indices = @transform_3, window_bounds = array<i64: 128, 128>}, {transform_indices = @transform_4, window_bounds = array<i64: 64, 128>}, {pipeline_mode = #tpu.pipeline_mode<synchronous>, transform_indices = @transform_5, window_bounds = array<i64: 1, 128>}, {pipeline_mode = #tpu.pipeline_mode<synchronous>, transform_indices = @transform_6, window_bounds = array<i64: 1, 128>}]} {
    %c0 = arith.constant 0 : index
    %c0_0 = arith.constant 0 : index
    %0 = vector.load %arg1[%c0, %c0_0] : memref<64x128xbf16, #tpu.memory_space<vmem>>, vector<64x128xbf16>
    %1 = arith.extf %0 : vector<64x128xbf16> to vector<64x128xf32>
    %c0_1 = arith.constant 0 : index
    %c0_2 = arith.constant 0 : index
    %2 = vector.load %arg2[%c0_1, %c0_2] : memref<1x128xf32, #tpu.memory_space<vmem>>, vector<1x128xf32>
    %3 = vector.broadcast %2 : vector<1x128xf32> to vector<64x128xf32>
    %4 = arith.mulf %1, %3 : vector<64x128xf32>
    %c0_3 = arith.constant 0 : index
    %c0_4 = arith.constant 0 : index
    %5 = vector.load %arg3[%c0_3, %c0_4] : memref<1x128xf32, #tpu.memory_space<vmem>>, vector<1x128xf32>
    %6 = vector.broadcast %5 : vector<1x128xf32> to vector<64x128xf32>
    %7 = arith.addf %4, %6 : vector<64x128xf32>
    %cst = arith.constant 0.000000e+00 : f32
    %8 = vector.broadcast %cst : f32 to vector<64x128xf32>
    %9 = arith.maximumf %7, %8 : vector<64x128xf32>
    %10 = arith.truncf %9 : vector<64x128xf32> to vector<64x128xbf16>
    %c0_5 = arith.constant 0 : index
    %c0_6 = arith.constant 0 : index
    %11 = vector.load %arg4[%c0_5, %c0_6] : memref<128x128xbf16, #tpu.memory_space<vmem>>, vector<128x128xbf16>
    %cst_7 = arith.constant dense<0.000000e+00> : vector<64x128xf32>
    %12 = tpu.matmul %10, %11, %cst_7 {dimension_numbers = #tpu.dot_dimension_numbers<[1], [0], [0], [1], [0, 0, 1, 1], [], []>} : vector<64x128xbf16>, vector<128x128xbf16>, vector<64x128xf32> -> vector<64x128xf32>
    %13 = arith.truncf %12 : vector<64x128xf32> to vector<64x128xbf16>
    %c0_8 = arith.constant 0 : index
    %c0_9 = arith.constant 0 : index
    %14 = vector.load %arg5[%c0_8, %c0_9] : memref<64x128xbf16, #tpu.memory_space<vmem>>, vector<64x128xbf16>
    tpu.vector_store %arg5[%c0_8, %c0_9], %13 {strides = array<i32>} : memref<64x128xbf16, #tpu.memory_space<vmem>>, vector<64x128xbf16>,
    %15 = arith.extf %13 : vector<64x128xbf16> to vector<64x128xf32>
    %c64_i32 = arith.constant 64 : i32
    %16 = arith.muli %arg0, %c64_i32 : i32
    %17 = tpu.iota {dimensions = array<i32: 0>} : vector<64x1xi32>
    %18 = vector.broadcast %16 : i32 to vector<64x1xi32>
    %19 = arith.addi %18, %17 : vector<64x1xi32>
    %c200_i32 = arith.constant 200 : i32
    %20 = vector.broadcast %c200_i32 : i32 to vector<64x1xi32>
    %21 = arith.cmpi slt, %19, %20 : vector<64x1xi32>
    %cst_10 = arith.constant 0.000000e+00 : f32
    %22 = vector.shape_cast %21 : vector<64x1xi1> to vector<64x1xi1>
    %23 = vector.broadcast %22 : vector<64x1xi1> to vector<64x128xi1>
    %24 = vector.broadcast %cst_10 : f32 to vector<64x128xf32>
    %25 = arith.select %23, %15, %24 : vector<64x128xi1>, vector<64x128xf32>
    %c0_i32 = arith.constant 0 : i32
    %26 = arith.cmpi eq, %arg0, %c0_i32 : i32
    %27 = arith.extui %26 : i1 to i32
    %c0_i32_11 = arith.constant 0 : i32
    %28 = arith.cmpi ne, %27, %c0_i32_11 : i32
    scf.if %28 {
      %cst_22 = arith.constant 0.000000e+00 : f32
      %40 = vector.broadcast %cst_22 : f32 to vector<1x128xf32>
      %c0_23 = arith.constant 0 : index
      %c0_24 = arith.constant 0 : index
      %41 = vector.load %arg6[%c0_23, %c0_24] : memref<1x128xf32, #tpu.memory_space<vmem>>, vector<1x128xf32>
      tpu.vector_store %arg6[%c0_23, %c0_24], %40 {strides = array<i32>} : memref<1x128xf32, #tpu.memory_space<vmem>>, vector<1x128xf32>,
      %cst_25 = arith.constant 0.000000e+00 : f32
      %42 = vector.broadcast %cst_25 : f32 to vector<1x128xf32>
      %c0_26 = arith.constant 0 : index
      %c0_27 = arith.constant 0 : index
      %43 = vector.load %arg7[%c0_26, %c0_27] : memref<1x128xf32, #tpu.memory_space<vmem>>, vector<1x128xf32>
      tpu.vector_store %arg7[%c0_26, %c0_27], %42 {strides = array<i32>} : memref<1x128xf32, #tpu.memory_space<vmem>>, vector<1x128xf32>,
    } else {
    }
    %c0_12 = arith.constant 0 : index
    %c0_13 = arith.constant 0 : index
    %29 = vector.load %arg6[%c0_12, %c0_13] : memref<1x128xf32, #tpu.memory_space<vmem>>, vector<1x128xf32>
    %cst_14 = arith.constant dense<0.000000e+00> : vector<128xf32>
    %30 = vector.multi_reduction <add>, %25, %cst_14 [0] : vector<64x128xf32> to vector<128xf32>
    %31 = vector.shape_cast %30 : vector<128xf32> to vector<1x128xf32>
    %32 = arith.addf %29, %31 : vector<1x128xf32>
    %c0_15 = arith.constant 0 : index
    %c0_16 = arith.constant 0 : index
    %33 = vector.load %arg6[%c0_15, %c0_16] : memref<1x128xf32, #tpu.memory_space<vmem>>, vector<1x128xf32>
    tpu.vector_store %arg6[%c0_15, %c0_16], %32 {strides = array<i32>} : memref<1x128xf32, #tpu.memory_space<vmem>>, vector<1x128xf32>,
    %c0_17 = arith.constant 0 : index
    %c0_18 = arith.constant 0 : index
    %34 = vector.load %arg7[%c0_17, %c0_18] : memref<1x128xf32, #tpu.memory_space<vmem>>, vector<1x128xf32>
    %35 = arith.mulf %25, %25 : vector<64x128xf32>
    %cst_19 = arith.constant dense<0.000000e+00> : vector<128xf32>
    %36 = vector.multi_reduction <add>, %35, %cst_19 [0] : vector<64x128xf32> to vector<128xf32>
    %37 = vector.shape_cast %36 : vector<128xf32> to vector<1x128xf32>
    %38 = arith.addf %34, %37 : vector<1x128xf32>
    %c0_20 = arith.constant 0 : index
    %c0_21 = arith.constant 0 : index
    %39 = vector.load %arg7[%c0_20, %c0_21] : memref<1x128xf32, #tpu.memory_space<vmem>>, vector<1x128xf32>
    tpu.vector_store %arg7[%c0_20, %c0_21], %38 {strides = array<i32>} : memref<1x128xf32, #tpu.memory_space<vmem>>, vector<1x128xf32>,
    return
  }
  func.func @transform_0(%arg0: i32) -> (i32, i32) {
    %c0_i32 = arith.constant 0 : i32
    %c0_i32_0 = arith.constant 0 : i32
    return %arg0, %c0_i32 : i32, i32
  }
  func.func @transform_1(%arg0: i32) -> (i32, i32) {
    %c0_i32 = arith.constant 0 : i32
    %c0_i32_0 = arith.constant 0 : i32
    %c0_i32_1 = arith.constant 0 : i32
    return %c0_i32, %c0_i32_0 : i32, i32
  }
  func.func @transform_2(%arg0: i32) -> (i32, i32) {
    %c0_i32 = arith.constant 0 : i32
    %c0_i32_0 = arith.constant 0 : i32
    %c0_i32_1 = arith.constant 0 : i32
    return %c0_i32, %c0_i32_0 : i32, i32
  }
  func.func @transform_3(%arg0: i32) -> (i32, i32) {
    %c0_i32 = arith.constant 0 : i32
    %c0_i32_0 = arith.constant 0 : i32
    %c0_i32_1 = arith.constant 0 : i32
    return %c0_i32, %c0_i32_0 : i32, i32
  }
  func.func @transform_4(%arg0: i32) -> (i32, i32) {
    %c0_i32 = arith.constant 0 : i32
    %c0_i32_0 = arith.constant 0 : i32
    return %arg0, %c0_i32 : i32, i32
  }
  func.func @transform_5(%arg0: i32) -> (i32, i32) {
    %c0_i32 = arith.constant 0 : i32
    %c0_i32_0 = arith.constant 0 : i32
    %c0_i32_1 = arith.constant 0 : i32
    return %c0_i32, %c0_i32_0 : i32, i32
  }
  func.func @transform_6(%arg0: i32) -> (i32, i32) {
    %c0_i32 = arith.constant 0 : i32
    %c0_i32_0 = arith.constant 0 : i32
    %c0_i32_1 = arith.constant 0 : i32
    return %c0_i32, %c0_i32_0 : i32, i32
  }
}

module attributes {stable_mosaic.version = 11 : i64} {
  func.func @_bn_res_mm_stats_kernel(%arg0: i32, %arg1: memref<64x128xbf16, #tpu.memory_space<vmem>>, %arg2: memref<64x128xf32, #tpu.memory_space<vmem>>, %arg3: memref<1x128xf32, #tpu.memory_space<vmem>>, %arg4: memref<1x128xf32, #tpu.memory_space<vmem>>, %arg5: memref<128x128xbf16, #tpu.memory_space<vmem>>, %arg6: memref<1x1xf32, #tpu.memory_space<smem>>, %arg7: memref<64x128xbf16, #tpu.memory_space<vmem>>, %arg8: memref<1x128xf32, #tpu.memory_space<vmem>>, %arg9: memref<1x128xf32, #tpu.memory_space<vmem>>) attributes {dimension_semantics = [#tpu.dimension_semantics<arbitrary>], iteration_bounds = array<i64: 4>, scalar_prefetch = 0 : i64, scratch_operands = 0 : i64, tpu.core_type = #tpu.core_type<tc>, window_params = [{transform_indices = @transform_0, window_bounds = array<i64: 64, 128>}, {transform_indices = @transform_1, window_bounds = array<i64: 64, 128>}, {pipeline_mode = #tpu.pipeline_mode<synchronous>, transform_indices = @transform_2, window_bounds = array<i64: 1, 128>}, {pipeline_mode = #tpu.pipeline_mode<synchronous>, transform_indices = @transform_3, window_bounds = array<i64: 1, 128>}, {pipeline_mode = #tpu.pipeline_mode<synchronous>, transform_indices = @transform_4, window_bounds = array<i64: 128, 128>}, {transform_indices = @transform_5, window_bounds = array<i64: 1, 1>}, {transform_indices = @transform_6, window_bounds = array<i64: 64, 128>}, {pipeline_mode = #tpu.pipeline_mode<synchronous>, transform_indices = @transform_7, window_bounds = array<i64: 1, 128>}, {pipeline_mode = #tpu.pipeline_mode<synchronous>, transform_indices = @transform_8, window_bounds = array<i64: 1, 128>}]} {
    %c0 = arith.constant 0 : index
    %c0_0 = arith.constant 0 : index
    %0 = vector.load %arg1[%c0, %c0_0] : memref<64x128xbf16, #tpu.memory_space<vmem>>, vector<64x128xbf16>
    %1 = arith.extf %0 : vector<64x128xbf16> to vector<64x128xf32>
    %c0_1 = arith.constant 0 : index
    %c0_2 = arith.constant 0 : index
    %2 = vector.load %arg3[%c0_1, %c0_2] : memref<1x128xf32, #tpu.memory_space<vmem>>, vector<1x128xf32>
    %3 = vector.broadcast %2 : vector<1x128xf32> to vector<64x128xf32>
    %4 = arith.mulf %1, %3 : vector<64x128xf32>
    %c0_3 = arith.constant 0 : index
    %c0_4 = arith.constant 0 : index
    %5 = vector.load %arg4[%c0_3, %c0_4] : memref<1x128xf32, #tpu.memory_space<vmem>>, vector<1x128xf32>
    %6 = vector.broadcast %5 : vector<1x128xf32> to vector<64x128xf32>
    %7 = arith.addf %4, %6 : vector<64x128xf32>
    %cst = arith.constant 0.000000e+00 : f32
    %8 = vector.broadcast %cst : f32 to vector<64x128xf32>
    %9 = arith.maximumf %7, %8 : vector<64x128xf32>
    %c0_5 = arith.constant 0 : index
    %c0_6 = arith.constant 0 : index
    %10 = memref.load %arg6[%c0_5, %c0_6] : memref<1x1xf32, #tpu.memory_space<smem>>
    %cst_7 = arith.constant 1.000000e+00 : f32
    %11 = arith.addf %cst_7, %10 : f32
    %c0_8 = arith.constant 0 : index
    %c0_9 = arith.constant 0 : index
    %12 = vector.load %arg2[%c0_8, %c0_9] : memref<64x128xf32, #tpu.memory_space<vmem>>, vector<64x128xf32>
    %13 = vector.broadcast %11 : f32 to vector<64x128xf32>
    %14 = arith.mulf %13, %12 : vector<64x128xf32>
    %15 = arith.addf %14, %9 : vector<64x128xf32>
    %16 = arith.truncf %15 : vector<64x128xf32> to vector<64x128xbf16>
    %c0_10 = arith.constant 0 : index
    %c0_11 = arith.constant 0 : index
    %17 = vector.load %arg5[%c0_10, %c0_11] : memref<128x128xbf16, #tpu.memory_space<vmem>>, vector<128x128xbf16>
    %cst_12 = arith.constant dense<0.000000e+00> : vector<64x128xf32>
    %18 = tpu.matmul %16, %17, %cst_12 {dimension_numbers = #tpu.dot_dimension_numbers<[1], [0], [0], [1], [0, 0, 1, 1], [], []>} : vector<64x128xbf16>, vector<128x128xbf16>, vector<64x128xf32> -> vector<64x128xf32>
    %19 = arith.truncf %18 : vector<64x128xf32> to vector<64x128xbf16>
    %c0_13 = arith.constant 0 : index
    %c0_14 = arith.constant 0 : index
    %20 = vector.load %arg7[%c0_13, %c0_14] : memref<64x128xbf16, #tpu.memory_space<vmem>>, vector<64x128xbf16>
    tpu.vector_store %arg7[%c0_13, %c0_14], %19 {strides = array<i32>} : memref<64x128xbf16, #tpu.memory_space<vmem>>, vector<64x128xbf16>,
    %21 = arith.extf %19 : vector<64x128xbf16> to vector<64x128xf32>
    %c64_i32 = arith.constant 64 : i32
    %22 = arith.muli %arg0, %c64_i32 : i32
    %23 = tpu.iota {dimensions = array<i32: 0>} : vector<64x1xi32>
    %24 = vector.broadcast %22 : i32 to vector<64x1xi32>
    %25 = arith.addi %24, %23 : vector<64x1xi32>
    %c200_i32 = arith.constant 200 : i32
    %26 = vector.broadcast %c200_i32 : i32 to vector<64x1xi32>
    %27 = arith.cmpi slt, %25, %26 : vector<64x1xi32>
    %cst_15 = arith.constant 0.000000e+00 : f32
    %28 = vector.shape_cast %27 : vector<64x1xi1> to vector<64x1xi1>
    %29 = vector.broadcast %28 : vector<64x1xi1> to vector<64x128xi1>
    %30 = vector.broadcast %cst_15 : f32 to vector<64x128xf32>
    %31 = arith.select %29, %21, %30 : vector<64x128xi1>, vector<64x128xf32>
    %c0_i32 = arith.constant 0 : i32
    %32 = arith.cmpi eq, %arg0, %c0_i32 : i32
    %33 = arith.extui %32 : i1 to i32
    %c0_i32_16 = arith.constant 0 : i32
    %34 = arith.cmpi ne, %33, %c0_i32_16 : i32
    scf.if %34 {
      %cst_27 = arith.constant 0.000000e+00 : f32
      %46 = vector.broadcast %cst_27 : f32 to vector<1x128xf32>
      %c0_28 = arith.constant 0 : index
      %c0_29 = arith.constant 0 : index
      %47 = vector.load %arg8[%c0_28, %c0_29] : memref<1x128xf32, #tpu.memory_space<vmem>>, vector<1x128xf32>
      tpu.vector_store %arg8[%c0_28, %c0_29], %46 {strides = array<i32>} : memref<1x128xf32, #tpu.memory_space<vmem>>, vector<1x128xf32>,
      %cst_30 = arith.constant 0.000000e+00 : f32
      %48 = vector.broadcast %cst_30 : f32 to vector<1x128xf32>
      %c0_31 = arith.constant 0 : index
      %c0_32 = arith.constant 0 : index
      %49 = vector.load %arg9[%c0_31, %c0_32] : memref<1x128xf32, #tpu.memory_space<vmem>>, vector<1x128xf32>
      tpu.vector_store %arg9[%c0_31, %c0_32], %48 {strides = array<i32>} : memref<1x128xf32, #tpu.memory_space<vmem>>, vector<1x128xf32>,
    } else {
    }
    %c0_17 = arith.constant 0 : index
    %c0_18 = arith.constant 0 : index
    %35 = vector.load %arg8[%c0_17, %c0_18] : memref<1x128xf32, #tpu.memory_space<vmem>>, vector<1x128xf32>
    %cst_19 = arith.constant dense<0.000000e+00> : vector<128xf32>
    %36 = vector.multi_reduction <add>, %31, %cst_19 [0] : vector<64x128xf32> to vector<128xf32>
    %37 = vector.shape_cast %36 : vector<128xf32> to vector<1x128xf32>
    %38 = arith.addf %35, %37 : vector<1x128xf32>
    %c0_20 = arith.constant 0 : index
    %c0_21 = arith.constant 0 : index
    %39 = vector.load %arg8[%c0_20, %c0_21] : memref<1x128xf32, #tpu.memory_space<vmem>>, vector<1x128xf32>
    tpu.vector_store %arg8[%c0_20, %c0_21], %38 {strides = array<i32>} : memref<1x128xf32, #tpu.memory_space<vmem>>, vector<1x128xf32>,
    %c0_22 = arith.constant 0 : index
    %c0_23 = arith.constant 0 : index
    %40 = vector.load %arg9[%c0_22, %c0_23] : memref<1x128xf32, #tpu.memory_space<vmem>>, vector<1x128xf32>
    %41 = arith.mulf %31, %31 : vector<64x128xf32>
    %cst_24 = arith.constant dense<0.000000e+00> : vector<128xf32>
    %42 = vector.multi_reduction <add>, %41, %cst_24 [0] : vector<64x128xf32> to vector<128xf32>
    %43 = vector.shape_cast %42 : vector<128xf32> to vector<1x128xf32>
    %44 = arith.addf %40, %43 : vector<1x128xf32>
    %c0_25 = arith.constant 0 : index
    %c0_26 = arith.constant 0 : index
    %45 = vector.load %arg9[%c0_25, %c0_26] : memref<1x128xf32, #tpu.memory_space<vmem>>, vector<1x128xf32>
    tpu.vector_store %arg9[%c0_25, %c0_26], %44 {strides = array<i32>} : memref<1x128xf32, #tpu.memory_space<vmem>>, vector<1x128xf32>,
    return
  }
  func.func @transform_0(%arg0: i32) -> (i32, i32) {
    %c0_i32 = arith.constant 0 : i32
    %c0_i32_0 = arith.constant 0 : i32
    return %arg0, %c0_i32 : i32, i32
  }
  func.func @transform_1(%arg0: i32) -> (i32, i32) {
    %c0_i32 = arith.constant 0 : i32
    %c0_i32_0 = arith.constant 0 : i32
    return %arg0, %c0_i32 : i32, i32
  }
  func.func @transform_2(%arg0: i32) -> (i32, i32) {
    %c0_i32 = arith.constant 0 : i32
    %c0_i32_0 = arith.constant 0 : i32
    %c0_i32_1 = arith.constant 0 : i32
    return %c0_i32, %c0_i32_0 : i32, i32
  }
  func.func @transform_3(%arg0: i32) -> (i32, i32) {
    %c0_i32 = arith.constant 0 : i32
    %c0_i32_0 = arith.constant 0 : i32
    %c0_i32_1 = arith.constant 0 : i32
    return %c0_i32, %c0_i32_0 : i32, i32
  }
  func.func @transform_4(%arg0: i32) -> (i32, i32) {
    %c0_i32 = arith.constant 0 : i32
    %c0_i32_0 = arith.constant 0 : i32
    %c0_i32_1 = arith.constant 0 : i32
    return %c0_i32, %c0_i32_0 : i32, i32
  }
  func.func @transform_5(%arg0: i32) -> (i32, i32) {
    %c0_i32 = arith.constant 0 : i32
    %c0_i32_0 = arith.constant 0 : i32
    %c0_i32_1 = arith.constant 0 : i32
    return %c0_i32, %c0_i32_0 : i32, i32
  }
  func.func @transform_6(%arg0: i32) -> (i32, i32) {
    %c0_i32 = arith.constant 0 : i32
    %c0_i32_0 = arith.constant 0 : i32
    return %arg0, %c0_i32 : i32, i32
  }
  func.func @transform_7(%arg0: i32) -> (i32, i32) {
    %c0_i32 = arith.constant 0 : i32
    %c0_i32_0 = arith.constant 0 : i32
    %c0_i32_1 = arith.constant 0 : i32
    return %c0_i32, %c0_i32_0 : i32, i32
  }
  func.func @transform_8(%arg0: i32) -> (i32, i32) {
    %c0_i32 = arith.constant 0 : i32
    %c0_i32_0 = arith.constant 0 : i32
    %c0_i32_1 = arith.constant 0 : i32
    return %c0_i32, %c0_i32_0 : i32, i32
  }
}

module attributes {stable_mosaic.version = 11 : i64} {
  func.func @_bn_relu_kernel(%arg0: i32, %arg1: memref<64x128xbf16, #tpu.memory_space<vmem>>, %arg2: memref<1x128xf32, #tpu.memory_space<vmem>>, %arg3: memref<1x128xf32, #tpu.memory_space<vmem>>, %arg4: memref<64x128xf32, #tpu.memory_space<vmem>>) attributes {dimension_semantics = [#tpu.dimension_semantics<parallel>], iteration_bounds = array<i64: 4>, scalar_prefetch = 0 : i64, scratch_operands = 0 : i64, tpu.core_type = #tpu.core_type<tc>, window_params = [{transform_indices = @transform_0, window_bounds = array<i64: 64, 128>}, {pipeline_mode = #tpu.pipeline_mode<synchronous>, transform_indices = @transform_1, window_bounds = array<i64: 1, 128>}, {pipeline_mode = #tpu.pipeline_mode<synchronous>, transform_indices = @transform_2, window_bounds = array<i64: 1, 128>}, {transform_indices = @transform_3, window_bounds = array<i64: 64, 128>}]} {
    %c0 = arith.constant 0 : index
    %c0_0 = arith.constant 0 : index
    %0 = vector.load %arg1[%c0, %c0_0] : memref<64x128xbf16, #tpu.memory_space<vmem>>, vector<64x128xbf16>
    %1 = arith.extf %0 : vector<64x128xbf16> to vector<64x128xf32>
    %c0_1 = arith.constant 0 : index
    %c0_2 = arith.constant 0 : index
    %2 = vector.load %arg2[%c0_1, %c0_2] : memref<1x128xf32, #tpu.memory_space<vmem>>, vector<1x128xf32>
    %3 = vector.broadcast %2 : vector<1x128xf32> to vector<64x128xf32>
    %4 = arith.mulf %1, %3 : vector<64x128xf32>
    %c0_3 = arith.constant 0 : index
    %c0_4 = arith.constant 0 : index
    %5 = vector.load %arg3[%c0_3, %c0_4] : memref<1x128xf32, #tpu.memory_space<vmem>>, vector<1x128xf32>
    %6 = vector.broadcast %5 : vector<1x128xf32> to vector<64x128xf32>
    %7 = arith.addf %4, %6 : vector<64x128xf32>
    %cst = arith.constant 0.000000e+00 : f32
    %8 = vector.broadcast %cst : f32 to vector<64x128xf32>
    %9 = arith.maximumf %7, %8 : vector<64x128xf32>
    %c0_5 = arith.constant 0 : index
    %c0_6 = arith.constant 0 : index
    %10 = vector.load %arg4[%c0_5, %c0_6] : memref<64x128xf32, #tpu.memory_space<vmem>>, vector<64x128xf32>
    tpu.vector_store %arg4[%c0_5, %c0_6], %9 {strides = array<i32>} : memref<64x128xf32, #tpu.memory_space<vmem>>, vector<64x128xf32>,
    return
  }
  func.func @transform_0(%arg0: i32) -> (i32, i32) {
    %c0_i32 = arith.constant 0 : i32
    %c0_i32_0 = arith.constant 0 : i32
    return %arg0, %c0_i32 : i32, i32
  }
  func.func @transform_1(%arg0: i32) -> (i32, i32) {
    %c0_i32 = arith.constant 0 : i32
    %c0_i32_0 = arith.constant 0 : i32
    %c0_i32_1 = arith.constant 0 : i32
    return %c0_i32, %c0_i32_0 : i32, i32
  }
  func.func @transform_2(%arg0: i32) -> (i32, i32) {
    %c0_i32 = arith.constant 0 : i32
    %c0_i32_0 = arith.constant 0 : i32
    %c0_i32_1 = arith.constant 0 : i32
    return %c0_i32, %c0_i32_0 : i32, i32
  }
  func.func @transform_3(%arg0: i32) -> (i32, i32) {
    %c0_i32 = arith.constant 0 : i32
    %c0_i32_0 = arith.constant 0 : i32
    return %arg0, %c0_i32 : i32, i32
  }
}

module attributes {stable_mosaic.version = 11 : i64} {
  func.func @_node_pre_mm_stats_kernel(%arg0: i32, %arg1: memref<64x128xf32, #tpu.memory_space<vmem>>, %arg2: memref<64x128xf32, #tpu.memory_space<vmem>>, %arg3: memref<64x1xf32, #tpu.memory_space<vmem>>, %arg4: memref<128x128xbf16, #tpu.memory_space<vmem>>, %arg5: memref<1x1xf32, #tpu.memory_space<smem>>, %arg6: memref<64x128xbf16, #tpu.memory_space<vmem>>, %arg7: memref<1x128xf32, #tpu.memory_space<vmem>>, %arg8: memref<1x128xf32, #tpu.memory_space<vmem>>) attributes {dimension_semantics = [#tpu.dimension_semantics<arbitrary>], iteration_bounds = array<i64: 4>, scalar_prefetch = 0 : i64, scratch_operands = 0 : i64, tpu.core_type = #tpu.core_type<tc>, window_params = [{transform_indices = @transform_0, window_bounds = array<i64: 64, 128>}, {transform_indices = @transform_1, window_bounds = array<i64: 64, 128>}, {transform_indices = @transform_2, window_bounds = array<i64: 64, 1>}, {pipeline_mode = #tpu.pipeline_mode<synchronous>, transform_indices = @transform_3, window_bounds = array<i64: 128, 128>}, {transform_indices = @transform_4, window_bounds = array<i64: 1, 1>}, {transform_indices = @transform_5, window_bounds = array<i64: 64, 128>}, {pipeline_mode = #tpu.pipeline_mode<synchronous>, transform_indices = @transform_6, window_bounds = array<i64: 1, 128>}, {pipeline_mode = #tpu.pipeline_mode<synchronous>, transform_indices = @transform_7, window_bounds = array<i64: 1, 128>}]} {
    %c0 = arith.constant 0 : index
    %c0_0 = arith.constant 0 : index
    %0 = vector.load %arg1[%c0, %c0_0] : memref<64x128xf32, #tpu.memory_space<vmem>>, vector<64x128xf32>
    %c0_1 = arith.constant 0 : index
    %c0_2 = arith.constant 0 : index
    %1 = memref.load %arg5[%c0_1, %c0_2] : memref<1x1xf32, #tpu.memory_space<smem>>
    %cst = arith.constant 1.000000e+00 : f32
    %2 = arith.addf %cst, %1 : f32
    %3 = vector.broadcast %2 : f32 to vector<64x128xf32>
    %4 = arith.mulf %3, %0 : vector<64x128xf32>
    %c0_3 = arith.constant 0 : index
    %c0_4 = arith.constant 0 : index
    %5 = vector.load %arg2[%c0_3, %c0_4] : memref<64x128xf32, #tpu.memory_space<vmem>>, vector<64x128xf32>
    %6 = arith.addf %4, %5 : vector<64x128xf32>
    %c0_5 = arith.constant 0 : index
    %c0_6 = arith.constant 0 : index
    %7 = vector.load %arg3[%c0_5, %c0_6] : memref<64x1xf32, #tpu.memory_space<vmem>>, vector<64x1xf32>
    %8 = vector.broadcast %7 : vector<64x1xf32> to vector<64x128xf32>
    %9 = arith.mulf %0, %8 : vector<64x128xf32>
    %10 = arith.subf %6, %9 : vector<64x128xf32>
    %11 = arith.truncf %10 : vector<64x128xf32> to vector<64x128xbf16>
    %c0_7 = arith.constant 0 : index
    %c0_8 = arith.constant 0 : index
    %12 = vector.load %arg4[%c0_7, %c0_8] : memref<128x128xbf16, #tpu.memory_space<vmem>>, vector<128x128xbf16>
    %cst_9 = arith.constant dense<0.000000e+00> : vector<64x128xf32>
    %13 = tpu.matmul %11, %12, %cst_9 {dimension_numbers = #tpu.dot_dimension_numbers<[1], [0], [0], [1], [0, 0, 1, 1], [], []>} : vector<64x128xbf16>, vector<128x128xbf16>, vector<64x128xf32> -> vector<64x128xf32>
    %14 = arith.truncf %13 : vector<64x128xf32> to vector<64x128xbf16>
    %c0_10 = arith.constant 0 : index
    %c0_11 = arith.constant 0 : index
    %15 = vector.load %arg6[%c0_10, %c0_11] : memref<64x128xbf16, #tpu.memory_space<vmem>>, vector<64x128xbf16>
    tpu.vector_store %arg6[%c0_10, %c0_11], %14 {strides = array<i32>} : memref<64x128xbf16, #tpu.memory_space<vmem>>, vector<64x128xbf16>,
    %16 = arith.extf %14 : vector<64x128xbf16> to vector<64x128xf32>
    %c64_i32 = arith.constant 64 : i32
    %17 = arith.muli %arg0, %c64_i32 : i32
    %18 = tpu.iota {dimensions = array<i32: 0>} : vector<64x1xi32>
    %19 = vector.broadcast %17 : i32 to vector<64x1xi32>
    %20 = arith.addi %19, %18 : vector<64x1xi32>
    %c200_i32 = arith.constant 200 : i32
    %21 = vector.broadcast %c200_i32 : i32 to vector<64x1xi32>
    %22 = arith.cmpi slt, %20, %21 : vector<64x1xi32>
    %cst_12 = arith.constant 0.000000e+00 : f32
    %23 = vector.shape_cast %22 : vector<64x1xi1> to vector<64x1xi1>
    %24 = vector.broadcast %23 : vector<64x1xi1> to vector<64x128xi1>
    %25 = vector.broadcast %cst_12 : f32 to vector<64x128xf32>
    %26 = arith.select %24, %16, %25 : vector<64x128xi1>, vector<64x128xf32>
    %c0_i32 = arith.constant 0 : i32
    %27 = arith.cmpi eq, %arg0, %c0_i32 : i32
    %28 = arith.extui %27 : i1 to i32
    %c0_i32_13 = arith.constant 0 : i32
    %29 = arith.cmpi ne, %28, %c0_i32_13 : i32
    scf.if %29 {
      %cst_24 = arith.constant 0.000000e+00 : f32
      %41 = vector.broadcast %cst_24 : f32 to vector<1x128xf32>
      %c0_25 = arith.constant 0 : index
      %c0_26 = arith.constant 0 : index
      %42 = vector.load %arg7[%c0_25, %c0_26] : memref<1x128xf32, #tpu.memory_space<vmem>>, vector<1x128xf32>
      tpu.vector_store %arg7[%c0_25, %c0_26], %41 {strides = array<i32>} : memref<1x128xf32, #tpu.memory_space<vmem>>, vector<1x128xf32>,
      %cst_27 = arith.constant 0.000000e+00 : f32
      %43 = vector.broadcast %cst_27 : f32 to vector<1x128xf32>
      %c0_28 = arith.constant 0 : index
      %c0_29 = arith.constant 0 : index
      %44 = vector.load %arg8[%c0_28, %c0_29] : memref<1x128xf32, #tpu.memory_space<vmem>>, vector<1x128xf32>
      tpu.vector_store %arg8[%c0_28, %c0_29], %43 {strides = array<i32>} : memref<1x128xf32, #tpu.memory_space<vmem>>, vector<1x128xf32>,
    } else {
    }
    %c0_14 = arith.constant 0 : index
    %c0_15 = arith.constant 0 : index
    %30 = vector.load %arg7[%c0_14, %c0_15] : memref<1x128xf32, #tpu.memory_space<vmem>>, vector<1x128xf32>
    %cst_16 = arith.constant dense<0.000000e+00> : vector<128xf32>
    %31 = vector.multi_reduction <add>, %26, %cst_16 [0] : vector<64x128xf32> to vector<128xf32>
    %32 = vector.shape_cast %31 : vector<128xf32> to vector<1x128xf32>
    %33 = arith.addf %30, %32 : vector<1x128xf32>
    %c0_17 = arith.constant 0 : index
    %c0_18 = arith.constant 0 : index
    %34 = vector.load %arg7[%c0_17, %c0_18] : memref<1x128xf32, #tpu.memory_space<vmem>>, vector<1x128xf32>
    tpu.vector_store %arg7[%c0_17, %c0_18], %33 {strides = array<i32>} : memref<1x128xf32, #tpu.memory_space<vmem>>, vector<1x128xf32>,
    %c0_19 = arith.constant 0 : index
    %c0_20 = arith.constant 0 : index
    %35 = vector.load %arg8[%c0_19, %c0_20] : memref<1x128xf32, #tpu.memory_space<vmem>>, vector<1x128xf32>
    %36 = arith.mulf %26, %26 : vector<64x128xf32>
    %cst_21 = arith.constant dense<0.000000e+00> : vector<128xf32>
    %37 = vector.multi_reduction <add>, %36, %cst_21 [0] : vector<64x128xf32> to vector<128xf32>
    %38 = vector.shape_cast %37 : vector<128xf32> to vector<1x128xf32>
    %39 = arith.addf %35, %38 : vector<1x128xf32>
    %c0_22 = arith.constant 0 : index
    %c0_23 = arith.constant 0 : index
    %40 = vector.load %arg8[%c0_22, %c0_23] : memref<1x128xf32, #tpu.memory_space<vmem>>, vector<1x128xf32>
    tpu.vector_store %arg8[%c0_22, %c0_23], %39 {strides = array<i32>} : memref<1x128xf32, #tpu.memory_space<vmem>>, vector<1x128xf32>,
    return
  }
  func.func @transform_0(%arg0: i32) -> (i32, i32) {
    %c0_i32 = arith.constant 0 : i32
    %c0_i32_0 = arith.constant 0 : i32
    return %arg0, %c0_i32 : i32, i32
  }
  func.func @transform_1(%arg0: i32) -> (i32, i32) {
    %c0_i32 = arith.constant 0 : i32
    %c0_i32_0 = arith.constant 0 : i32
    return %arg0, %c0_i32 : i32, i32
  }
  func.func @transform_2(%arg0: i32) -> (i32, i32) {
    %c0_i32 = arith.constant 0 : i32
    %c0_i32_0 = arith.constant 0 : i32
    return %arg0, %c0_i32 : i32, i32
  }
  func.func @transform_3(%arg0: i32) -> (i32, i32) {
    %c0_i32 = arith.constant 0 : i32
    %c0_i32_0 = arith.constant 0 : i32
    %c0_i32_1 = arith.constant 0 : i32
    return %c0_i32, %c0_i32_0 : i32, i32
  }
  func.func @transform_4(%arg0: i32) -> (i32, i32) {
    %c0_i32 = arith.constant 0 : i32
    %c0_i32_0 = arith.constant 0 : i32
    %c0_i32_1 = arith.constant 0 : i32
    return %c0_i32, %c0_i32_0 : i32, i32
  }
  func.func @transform_5(%arg0: i32) -> (i32, i32) {
    %c0_i32 = arith.constant 0 : i32
    %c0_i32_0 = arith.constant 0 : i32
    return %arg0, %c0_i32 : i32, i32
  }
  func.func @transform_6(%arg0: i32) -> (i32, i32) {
    %c0_i32 = arith.constant 0 : i32
    %c0_i32_0 = arith.constant 0 : i32
    %c0_i32_1 = arith.constant 0 : i32
    return %c0_i32, %c0_i32_0 : i32, i32
  }
  func.func @transform_7(%arg0: i32) -> (i32, i32) {
    %c0_i32 = arith.constant 0 : i32
    %c0_i32_0 = arith.constant 0 : i32
    %c0_i32_1 = arith.constant 0 : i32
    return %c0_i32, %c0_i32_0 : i32, i32
  }
}

</mosaic_0001>

<bundles_post_ra>
// kernel: node_edge_forward.8
= control target key start
LH: loop header
LB: loop body
LE: loop exit
PB: predicated region body
PF: predicated region fallthrough
CT: control target
= control target key end

     0   :  { %s859_s15 = smov 0   ;;  %s971_s0 = inlined_call_operand.vmem [shape: bf16[256,256], index: 0, kind: input, shape index: {}]   ;;  %s972_s1 = inlined_call_operand.vmem [shape: bf16[256,128], index: 1, kind: input, shape index: {}]   ;;  %s973_s2 = inlined_call_operand.vmem [shape: bf16[256,128], index: 2, kind: output, shape index: {0}]   ;;  %s974_s3 = inlined_call_operand.vmem [shape: f32[1,128], index: 3, kind: output, shape index: {1}]   ;;  %s975_s4 = inlined_call_operand.vmem [shape: f32[1,128], index: 4, kind: output, shape index: {2}]  }
   0x1 LB: > { %s865_s16 = sadd.s32 4294967295, %s831_s15   ;;  %p658_p0 = scmp.ge.s32.totalorder %s831_s15, 1  ;;  %s831_s15 = sphi %s859_s15, %s15_s15  }
   0x2   : > { %p159_p1 = scmp.lt.s32.totalorder %s831_s15, 5 }
   0x4   : > { %p160_p2 = pnand %p658_p0, %p159_p1 }
   0x5   : > { %v797_v0 = vld [vmem:[%s972_s1 + $0x40] sm:$0xff] (!%p160_p2)   ;;  %s659_s19 = sshll.u32 (!%p160_p2), %s865_s16, 3  ;;  %v799_v2 = vld [vmem:[%s972_s1 + $0x48] sm:$0xff] (!%p160_p2)   ;;  %v801_v4 = vld [vmem:[%s972_s1 + $0x50] sm:$0xff] (!%p160_p2)   ;;  %v490_v24 = vlaneseq (!%p160_p2)  ;;  %s696_s5 = sshll.u32 (!%p160_p2), %s865_s16, 6 }
   0x6   : > { %163 = sbr.rel (%p160_p2) target bundleno = 299 (0x12b), region = 28  ;;  %v798_v1 = vld [vmem:[%s972_s1] sm:$0xff] (!%p160_p2)   ;;  %732 = vmatprep.subr.bf16.mxu0 (!%p160_p2), %v797_v0  ;;  %772 = vmatprep.subr.bf16.mxu1 (!%p160_p2), %v797_v0  ;;  %v800_v3 = vld [vmem:[%s972_s1 + $0x8] sm:$0xff] (!%p160_p2)   ;;  %p187_p3 = scmp.lt.s32.totalorder (!%p160_p2), %s659_s19, 31  ;;  %v802_v5 = vld [vmem:[%s972_s1 + $0x10] sm:$0xff] (!%p160_p2)   ;;  %v499_v27 = vstv (!%p160_p2), %s696_s5 }
   0x7   : > { %733 = vmatpush3.bf16.msra.mxu0 (!%p160_p2), %v798_v1  ;;  %780 = vmatpush3.bf16.msra.mxu1 (!%p160_p2), %v798_v1  ;;  %v803_v6 = vld [vmem:[%s972_s1 + $0x58] sm:$0xff] (!%p160_p2)   ;;  %v805_v8 = vld [vmem:[%s972_s1 + $0x60] sm:$0xff] (!%p160_p2)   ;;  %v807_v10 = vld [vmem:[%s972_s1 + $0x68] sm:$0xff] (!%p160_p2)   ;;  %v491_v25 = vshrl.u32 (!%p160_p2), %v490_v24, 7  ;;  %p697_p4 = scmp.ne.s32.totalorder (!%p160_p2), %s865_s16, 0 }
   0x8   : > { %734 = vmatprep.subr.bf16.mxu0 (!%p160_p2), %v799_v2  ;;  %773 = vmatprep.subr.bf16.mxu1 (!%p160_p2), %v799_v2  ;;  %v804_v7 = vld [vmem:[%s972_s1 + $0x18] sm:$0xff] (!%p160_p2)   ;;  %v806_v9 = vld [vmem:[%s972_s1 + $0x20] sm:$0xff] (!%p160_p2)   ;;  %v808_v13 = vld [vmem:[%s972_s1 + $0x28] sm:$0xff] (!%p160_p2)  }
   0x9   : > { %v809_v14 = vld [vmem:[%s972_s1 + $0x70] sm:$0xff] (!%p160_p2)   ;;  %v811_v16 = vld [vmem:[%s972_s1 + $0x78] sm:$0xff] (!%p160_p2)   ;;  %v492_v26 = vadd.s32 (!%p160_p2), 8, %v491_v25  ;;  %v495_v28 = vadd.s32 (!%p160_p2), 32, %v491_v25  ;;  %v496_v29 = vadd.s32 (!%p160_p2), 40, %v491_v25  ;;  %v500_v38 = vadd.s32 (!%p160_p2), %v499_v27, %v491_v25 }
   0xa   : > { %v810_v15 = vld [vmem:[%s972_s1 + $0x30] sm:$0xff] (!%p160_p2)   ;;  %v812_v17 = vld [vmem:[%s972_s1 + $0x38] sm:$0xff] (!%p160_p2)   ;;  %v493_v46 = vadd.s32 (!%p160_p2), 16, %v491_v25  ;;  %v494_v47 = vadd.s32 (!%p160_p2), 24, %v491_v25  ;;  %v497_v50 = vadd.s32 (!%p160_p2), 48, %v491_v25  ;;  %v498_v51 = vadd.s32 (!%p160_p2), 56, %v491_v25 }
   0xb   : > { %735 = vmatpush3.bf16.msra.mxu0 (!%p160_p2), %v800_v3  ;;  %781 = vmatpush3.bf16.msra.mxu1 (!%p160_p2), %v800_v3  ;;  %v501_v39 = vadd.s32 (!%p160_p2), %v499_v27, %v492_v26  ;;  %v504_v42 = vadd.s32 (!%p160_p2), %v499_v27, %v495_v28  ;;  %v505_v43 = vadd.s32 (!%p160_p2), %v499_v27, %v496_v29  ;;  %vm508_vm0 = vcmp.lt.s32.totalorder (!%p160_p2), %v500_v38, 200 }
   0xc   : > { %736 = vmatprep.subr.bf16.mxu0 (!%p160_p2), %v801_v4  ;;  %774 = vmatprep.subr.bf16.mxu1 (!%p160_p2), %v801_v4  ;;  %v502_v60 = vadd.s32 (!%p160_p2), %v499_v27, %v493_v46  ;;  %v503_v61 = vadd.s32 (!%p160_p2), %v499_v27, %v494_v47 }
   0xd   : > { %s977_s19 = smov (!%p187_p3, %s659_s19), 31  ;;  %vm509_vm1 = vcmp.lt.s32.totalorder %v501_v39, 200  ;;  %vm512_vm2 = vcmp.lt.s32.totalorder %v504_v42, 200  ;;  %vm513_vm3 = vcmp.lt.s32.totalorder %v505_v43, 200 }
   0xe   : > { %s700_s8 = sshll.u32 %s977_s19, 3  ;;  %s663_s6 = sshll.u32 %s977_s19, 2  ;;  %vm510_vm4 = vcmp.lt.s32.totalorder %v502_v60, 200  ;;  %vm511_vm5 = vcmp.lt.s32.totalorder %v503_v61, 200 }
   0xf   : > { %737 = vmatpush3.bf16.msra.mxu0 %v802_v5  ;;  %782 = vmatpush3.bf16.msra.mxu1 %v802_v5  ;;  %s903_s13 = scalar_lea.vmem %s971_s0, %s700_s8  ;;  %s939_s9 = scalar_lea.vmem %s973_s2, %s663_s6 }
  0x10   : > { %738 = vmatprep.subr.bf16.mxu0 %v803_v6  ;;  %775 = vmatprep.subr.bf16.mxu1 %v803_v6  ;;  %v815_v11 = vld [vmem:[%s903_s13 + $0x4] ss:$8 sps:$4 sm:$0xff]   ;;  %v813_v18 = vld [vmem:[%s903_s13] ss:$8 sps:$4 sm:$0xff]   ;;  %v819_v20 = vld [vmem:[%s903_s13 + $0x14] ss:$8 sps:$4 sm:$0xff]  }
  0x11   : > { %v818_v12 = vld [vmem:[%s903_s13 + $0x24] ss:$8 sps:$4 sm:$0xff]   ;;  %408 = vmatprep.mubr.bf16.mxu0 %v815_v11  ;;  %v816_v19 = vld [vmem:[%s903_s13 + $0x20] ss:$8 sps:$4 sm:$0xff]   ;;  %v821_v21 = vld [vmem:[%s903_s13 + $0x34] ss:$8 sps:$4 sm:$0xff]  }
  0x12   : > { %424 = vmatprep.mubr.bf16.mxu1 %v818_v12  ;;  %v823_v22 = vld [vmem:[%s903_s13 + $0x10] ss:$8 sps:$4 sm:$0xff]  }
  0x13   : > { %739 = vmatpush3.bf16.msra.mxu0 %v804_v7  ;;  %783 = vmatpush3.bf16.msra.mxu1 %v804_v7  ;;  %v824_v23 = vld [vmem:[%s903_s13 + $0x30] ss:$8 sps:$4 sm:$0xff]  }
  0x14   : > { %740 = vmatprep.subr.bf16.mxu0 %v805_v8  ;;  %776 = vmatprep.subr.bf16.mxu1 %v805_v8  ;;  %v506_v8 = vadd.s32 %v499_v27, %v497_v50 }
  0x16   : > { %vm514_vm6 = vcmp.lt.s32.totalorder %v506_v8, 200 }
  0x17   : > { %741 = vmatpush3.bf16.msra.mxu0 %v806_v9  ;;  %784 = vmatpush3.bf16.msra.mxu1 %v806_v9  ;;  %v507_v9 = vadd.s32 %v499_v27, %v498_v51 }
  0x18   : > { %742 = vmatprep.subr.bf16.mxu0 %v807_v10  ;;  %777 = vmatprep.subr.bf16.mxu1 %v807_v10 }
  0x19   : > { %vm515_vm7 = vcmp.lt.s32.totalorder %v507_v9, 200 }
  0x1b   : > { %743 = vmatpush3.bf16.msra.mxu0 %v808_v13  ;;  %785 = vmatpush3.bf16.msra.mxu1 %v808_v13 }
  0x1c   : > { %744 = vmatprep.subr.bf16.mxu0 %v809_v14  ;;  %778 = vmatprep.subr.bf16.mxu1 %v809_v14 }
  0x1f   : > { %745 = vmatpush3.bf16.msra.mxu0 %v810_v15  ;;  %786 = vmatpush3.bf16.msra.mxu1 %v810_v15 }
  0x20   : > { %746 = vmatprep.subr.bf16.mxu0 %v811_v16  ;;  %779 = vmatprep.subr.bf16.mxu1 %v811_v16 }
  0x23   : > { %747 = vmatpush3.bf16.msra.mxu0 %v812_v17  ;;  %787 = vmatpush3.bf16.msra.mxu1 %v812_v17 }
  0x26   : > { %409 = vmatmul.mubr.bf16.vlgmr.msra.gmra.mrb[0].mxu0 %v813_v18  ;;  %425 = vmatmul.mubr.bf16.vlgmr.msra.gmra.mrb[0].mxu1 %v816_v19 }
  0x27   : > { %416 = vmatprep.mubr.bf16.mxu0 %v819_v20  ;;  %432 = vmatprep.mubr.bf16.mxu1 %v821_v21 }
  0x2e   : > { %417 = vmatmul.mubr.bf16.gmra.mrb[4].mxu0 %v823_v22  ;;  %433 = vmatmul.mubr.bf16.gmra.mrb[4].mxu1 %v824_v23  ;;  %v833_v22 = vmov (!%p697_p4), 0.0  }
  0x2f   : > { %544 = vst [vmem:[%s974_s3] sm:$0x1] (!%p697_p4), %v833_v22  ;;  %545 = vst [vmem:[%s975_s4] sm:$0x1] (!%p697_p4), %v833_v22 }
  0xf9   : > { %v748_v30 = vpop.f32.mrb[0].mxu0  ;;  %v760_v31 = vpop.f32.mrb[0].mxu1 }
  0xfa   : > { %v749_v32 = vpop.f32.mrb[1].mxu0  ;;  %v761_v33 = vpop.f32.mrb[1].mxu1 }
  0xfb   : > { %v750_v34 = vadd.f32 %v749_v32, %v748_v30  ;;  %v762_v35 = vadd.f32 %v761_v33, %v760_v31  ;;  %v751_v36 = vpop.f32.mrb[2].mxu0  ;;  %v763_v37 = vpop.f32.mrb[2].mxu1 }
  0xfc   : > { %v752_v40 = vpop.f32.mrb[3].mxu0  ;;  %v764_v41 = vpop.f32.mrb[3].mxu1 }
  0xfd   : > { %v753_v44 = vadd.f32 %v752_v40, %v751_v36  ;;  %v765_v45 = vadd.f32 %v764_v41, %v763_v37 }
  0xff   : > { %v441_v48 = vpack.c.bf16 %v753_v44, %v750_v34  ;;  %v443_v49 = vpack.c.bf16 %v765_v45, %v762_v35 }
 0x101   : > { %713 = vst [vmem:[%s939_s9] sm:$0xff] %v441_v48   ;;  %v481_v52 = vunpack.c.l.bf16 %v441_v48  ;;  %v482_v53 = vunpack.c.h.bf16 %v441_v48  ;;  %730 = vst [vmem:[%s939_s9 + $0x10] sm:$0xff] %v443_v49   ;;  %v485_v54 = vunpack.c.l.bf16 %v443_v49  ;;  %v486_v55 = vunpack.c.h.bf16 %v443_v49  ;;  %v754_v56 = vpop.f32.mrb[4].mxu0  ;;  %v766_v57 = vpop.f32.mrb[4].mxu1 }
 0x102   : > { %v755_v58 = vpop.f32.mrb[5].mxu0  ;;  %v767_v59 = vpop.f32.mrb[5].mxu1 }
 0x103   : > { %v532_v62 = vsel %vm508_vm0, %v481_v52, 0.0  ;;  %v533_v63 = vsel %vm509_vm1, %v482_v53, 0.0  ;;  %v536_v0 = vsel %vm512_vm2, %v485_v54, 0.0  ;;  %v537_v1 = vsel %vm513_vm3, %v486_v55, 0.0  ;;  %v757_v2 = vpop.f32.mrb[6].mxu0  ;;  %v769_v3 = vpop.f32.mrb[6].mxu1 }
 0x104   : > { %v756_v4 = vadd.f32 %v755_v58, %v754_v56  ;;  %v768_v5 = vadd.f32 %v767_v59, %v766_v57  ;;  %v758_v6 = vpop.f32.mrb[7].mxu0  ;;  %v770_v7 = vpop.f32.mrb[7].mxu1 }
 0x105   : > { %v759_v10 = vadd.f32 %v758_v6, %v757_v2  ;;  %v771_v11 = vadd.f32 %v770_v7, %v769_v3  ;;  %543 = sbr.rel (%p697_p4) target bundleno = 268 (0x10c), region = 32 }
 0x107   : > { %v442_v12 = vpack.c.bf16 %v759_v10, %v756_v4  ;;  %v444_v13 = vpack.c.bf16 %v771_v11, %v768_v5 }
 0x109   : > { %729 = vst [vmem:[%s939_s9 + $0x8] sm:$0xff] %v442_v12   ;;  %v483_v14 = vunpack.c.l.bf16 %v442_v12  ;;  %v484_v15 = vunpack.c.h.bf16 %v442_v12  ;;  %731 = vst [vmem:[%s939_s9 + $0x18] sm:$0xff] %v444_v13   ;;  %v487_v16 = vunpack.c.l.bf16 %v444_v13  ;;  %v488_v17 = vunpack.c.h.bf16 %v444_v13 }
 0x10b   : > { %v534_v18 = vsel %vm510_vm4, %v483_v14, 0.0  ;;  %v535_v19 = vsel %vm511_vm5, %v484_v15, 0.0  ;;  %v538_v20 = vsel %vm514_vm6, %v487_v16, 0.0  ;;  %v539_v21 = vsel %vm515_vm7, %v488_v17, 0.0 }
 0x10c PF: > { %v547_v23 = vadd.f32 %v533_v63, %v532_v62  ;;  %v563_v24 = vmul.f32 %v532_v62, %v532_v62  ;;  %v564_v25 = vmul.f32 %v533_v63, %v533_v63  ;;  %v565_v26 = vmul.f32 %v534_v18, %v534_v18  ;;  %v546_v54 = vld [vmem:[%s974_s3] sm:$0x1] }
 0x10d   : > { %v566_v28 = vmul.f32 %v535_v19, %v535_v19  ;;  %v567_v31 = vmul.f32 %v536_v0, %v536_v0  ;;  %v568_v34 = vmul.f32 %v537_v1, %v537_v1  ;;  %v569_v37 = vmul.f32 %v538_v20, %v538_v20  ;;  %v562_v57 = vld [vmem:[%s975_s4] sm:$0x1] }
 0x10e   : > { %v548_v27 = vadd.f32 %v547_v23, %v534_v18  ;;  %v571_v29 = vadd.f32 %v564_v25, %v563_v24  ;;  %v570_v40 = vmul.f32 %v539_v21, %v539_v21 }
 0x110   : > { %v549_v30 = vadd.f32 %v548_v27, %v535_v19  ;;  %v572_v32 = vadd.f32 %v571_v29, %v565_v26 }
 0x112   : > { %v550_v33 = vadd.f32 %v549_v30, %v536_v0  ;;  %v573_v35 = vadd.f32 %v572_v32, %v566_v28 }
 0x114   : > { %v551_v36 = vadd.f32 %v550_v33, %v537_v1  ;;  %v574_v38 = vadd.f32 %v573_v35, %v567_v31 }
 0x116   : > { %v552_v39 = vadd.f32 %v551_v36, %v538_v20  ;;  %v575_v41 = vadd.f32 %v574_v38, %v568_v34 }
 0x118   : > { %v553_v42 = vadd.f32 %v552_v39, %v539_v21  ;;  %v576_v43 = vadd.f32 %v575_v41, %v569_v37 }
 0x11a   : > { %v554_v44 = vrot.slane %v553_v42, 4  ;;  %v577_v45 = vadd.f32 %v576_v43, %v570_v40 }
 0x11c   : > { %v555_v46 = vadd.f32 %v554_v44, %v553_v42  ;;  %v578_v47 = vrot.slane %v577_v45, 4 }
 0x11e   : > { %v556_v48 = vrot.slane %v555_v46, 2  ;;  %v579_v49 = vadd.f32 %v578_v47, %v577_v45 }
 0x120   : > { %v557_v50 = vadd.f32 %v556_v48, %v555_v46  ;;  %v580_v51 = vrot.slane %v579_v49, 2 }
 0x122   : > { %v558_v52 = vrot.slane %v557_v50, 1  ;;  %v581_v53 = vadd.f32 %v580_v51, %v579_v49 }
 0x124   : > { %v559_v55 = vadd.f32 %v558_v52, %v557_v50  ;;  %v582_v56 = vrot.slane %v581_v53, 1 }
 0x126   : > { %v560_v58 = vadd.f32 %v559_v55, %v546_v54  ;;  %v583_v59 = vadd.f32 %v582_v56, %v581_v53 }
 0x128   : > { %561 = vst [vmem:[%s974_s3] sm:$0x1] %v560_v58  ;;  %v584_v60 = vadd.f32 %v583_v59, %v562_v57 }
 0x12a   : > { %585 = vst [vmem:[%s975_s4] sm:$0x1] %v584_v60 }
 0x12b PF: > { %s15_s15 = sadd.s32 1, %s831_s15  }
 0x12c   : > { %p12_p5 = scmp.ge.s32.totalorder %s15_s15, 6  }
 0x12e   :  { %14 = sbr.rel (!%p12_p5) target bundleno = 1 (0x1), region = 78 }

// kernel: node_edge_forward.9
= control target key start
LH: loop header
LB: loop body
LE: loop exit
PB: predicated region body
PF: predicated region fallthrough
CT: control target
= control target key end

     0   :  { %s845_s21 = smov 0   ;;  %s930_s0 = inlined_call_operand.vmem [shape: bf16[256,128], index: 0, kind: input, shape index: {}]   ;;  %s931_s1 = inlined_call_operand.vmem [shape: f32[1,128], index: 1, kind: input, shape index: {}]   ;;  %s932_s2 = inlined_call_operand.vmem [shape: f32[1,128], index: 2, kind: input, shape index: {}]   ;;  %s933_s3 = inlined_call_operand.vmem [shape: bf16[128,128], index: 3, kind: input, shape index: {}]   ;;  %s934_s4 = inlined_call_operand.vmem [shape: bf16[256,128], index: 4, kind: output, shape index: {0}]   ;;  %s935_s5 = inlined_call_operand.vmem [shape: f32[1,128], index: 5, kind: output, shape index: {1}]   ;;  %s936_s6 = inlined_call_operand.vmem [shape: f32[1,128], index: 6, kind: output, shape index: {2}]  }
   0x1 LB: > { %s851_s22 = sadd.s32 4294967295, %s807_s21   ;;  %p655_p0 = scmp.ge.s32.totalorder %s807_s21, 1  ;;  %s807_s21 = sphi %s845_s21, %s17_s21  }
   0x2   : > { %p208_p1 = scmp.lt.s32.totalorder %s807_s21, 5 }
   0x4   : > { %p209_p2 = pnand %p655_p0, %p208_p1 }
   0x5   : > { %v793_v0 = vld [vmem:[%s933_s3] sm:$0xff] (!%p209_p2)   ;;  %s656_s25 = sshll.u32 (!%p209_p2), %s851_s22, 3  ;;  %v794_v1 = vld [vmem:[%s933_s3 + $0x8] sm:$0xff] (!%p209_p2)   ;;  %v795_v2 = vld [vmem:[%s933_s3 + $0x10] sm:$0xff] (!%p209_p2)   ;;  %v487_v50 = vlaneseq (!%p209_p2)  ;;  %s678_s27 = sshll.u32 (!%p209_p2), %s851_s22, 6 }
   0x6   : > { %212 = sbr.rel (%p209_p2) target bundleno = 290 (0x122), region = 36  ;;  %p239_p3 = scmp.lt.s32.totalorder (!%p209_p2), %s656_s25, 31  ;;  %744 = vmatprep.subr.bf16.mxu0 (!%p209_p2), %v793_v0  ;;  %768 = vmatprep.subr.bf16.mxu1 (!%p209_p2), %v793_v0  ;;  %v796_v3 = vld [vmem:[%s933_s3 + $0x18] sm:$0xff] (!%p209_p2)   ;;  %v660_v5 = vld [vmem:[%s931_s1] ss:$0 sm:$0xff] (!%p209_p2)  ;;  %v798_v29 = vld [vmem:[%s933_s3 + $0x28] sm:$0xff] (!%p209_p2)   ;;  %v496_v56 = vstv (!%p209_p2), %s678_s27 }
   0x7   : > { %745 = vmatpush3.bf16.msra.mxu0 (!%p209_p2), %v793_v0  ;;  %776 = vmatpush3.bf16.msra.mxu1 (!%p209_p2), %v793_v0  ;;  %v661_v9 = vld [vmem:[%s932_s2] ss:$0 sm:$0xff] (!%p209_p2)  ;;  %v799_v38 = vld [vmem:[%s933_s3 + $0x30] sm:$0xff] (!%p209_p2)   ;;  %v800_v43 = vld [vmem:[%s933_s3 + $0x38] sm:$0xff] (!%p209_p2)   ;;  %v488_v51 = vshrl.u32 (!%p209_p2), %v487_v50, 7  ;;  %p679_p4 = scmp.ne.s32.totalorder (!%p209_p2), %s851_s22, 0 }
   0x8   : > { %746 = vmatprep.subr.bf16.mxu0 (!%p209_p2), %v794_v1  ;;  %769 = vmatprep.subr.bf16.mxu1 (!%p209_p2), %v794_v1  ;;  %v797_v16 = vld [vmem:[%s933_s3 + $0x20] sm:$0xff] (!%p209_p2)  }
   0x9   : > { %v490_v52 = vadd.s32 (!%p209_p2), 16, %v488_v51  ;;  %v491_v53 = vadd.s32 (!%p209_p2), 24, %v488_v51  ;;  %v494_v54 = vadd.s32 (!%p209_p2), 48, %v488_v51  ;;  %v495_v55 = vadd.s32 (!%p209_p2), 56, %v488_v51 }
   0xa   : > { %v489_v57 = vadd.s32 (!%p209_p2), 8, %v488_v51  ;;  %v492_v58 = vadd.s32 (!%p209_p2), 32, %v488_v51  ;;  %v493_v59 = vadd.s32 (!%p209_p2), 40, %v488_v51  ;;  %v497_v0 = vadd.s32 (!%p209_p2), %v496_v56, %v488_v51 }
   0xb   : > { %747 = vmatpush3.bf16.msra.mxu0 (!%p209_p2), %v794_v1  ;;  %777 = vmatpush3.bf16.msra.mxu1 (!%p209_p2), %v794_v1  ;;  %v499_v60 = vadd.s32 (!%p209_p2), %v496_v56, %v490_v52  ;;  %v500_v61 = vadd.s32 (!%p209_p2), %v496_v56, %v491_v53  ;;  %v503_v62 = vadd.s32 (!%p209_p2), %v496_v56, %v494_v54 }
   0xc   : > { %748 = vmatprep.subr.bf16.mxu0 (!%p209_p2), %v795_v2  ;;  %770 = vmatprep.subr.bf16.mxu1 (!%p209_p2), %v795_v2  ;;  %v504_v63 = vadd.s32 (!%p209_p2), %v496_v56, %v495_v55  ;;  %v498_v1 = vadd.s32 (!%p209_p2), %v496_v56, %v489_v57  ;;  %vm505_vm4 = vcmp.lt.s32.totalorder (!%p209_p2), %v497_v0, 200 }
   0xd   : > { %s938_s25 = smov (!%p239_p3, %s656_s25), 31  ;;  %vm507_vm0 = vcmp.lt.s32.totalorder %v499_v60, 200  ;;  %vm508_vm1 = vcmp.lt.s32.totalorder %v500_v61, 200  ;;  %vm511_vm2 = vcmp.lt.s32.totalorder %v503_v62, 200 }
   0xe   : > { %s657_s30 = sshll.u32 %s938_s25, 2  ;;  %vm512_vm3 = vcmp.lt.s32.totalorder %v504_v63, 200  ;;  %vm506_vm5 = vcmp.lt.s32.totalorder %v498_v1, 200 }
   0xf   : > { %s242_s9 = scalar_lea.vmem %s930_s0, %s657_s30  ;;  %749 = vmatpush3.bf16.msra.mxu0 %v795_v2  ;;  %778 = vmatpush3.bf16.msra.mxu1 %v795_v2  ;;  %s248_s7 = scalar_lea.vmem %s934_s4, %s657_s30 }
  0x10   : > { %v691_v4 = vld [vmem:[%s242_s9] sm:$0xff]   ;;  %v727_v8 = vld [vmem:[%s242_s9 + $0x10] sm:$0xff]   ;;  %v726_v12 = vld [vmem:[%s242_s9 + $0x8] sm:$0xff]   ;;  %750 = vmatprep.subr.bf16.mxu0 %v796_v3  ;;  %771 = vmatprep.subr.bf16.mxu1 %v796_v3 }
  0x11   : > { %v692_v6 = vunpack.c.l.bf16 %v691_v4  ;;  %v693_v7 = vunpack.c.h.bf16 %v691_v4  ;;  %v700_v10 = vunpack.c.l.bf16 %v727_v8  ;;  %v701_v11 = vunpack.c.h.bf16 %v727_v8  ;;  %v728_v15 = vld [vmem:[%s242_s9 + $0x18] sm:$0xff]  }
  0x12   : > { %v696_v21 = vunpack.c.l.bf16 %v726_v12  ;;  %v697_v22 = vunpack.c.h.bf16 %v726_v12  ;;  %v704_v25 = vunpack.c.l.bf16 %v728_v15  ;;  %v705_v26 = vunpack.c.h.bf16 %v728_v15 }
  0x13   : > { %v274_v13 = vmul.f32 %v692_v6, %v660_v5  ;;  %v275_v14 = vmul.f32 %v693_v7, %v660_v5  ;;  %v278_v17 = vmul.f32 %v700_v10, %v660_v5  ;;  %v279_v18 = vmul.f32 %v701_v11, %v660_v5  ;;  %751 = vmatpush3.bf16.msra.mxu0 %v796_v3 }
  0x14   : > { %779 = vmatpush3.bf16.msra.mxu1 %v796_v3  ;;  %752 = vmatprep.subr.bf16.mxu0 %v797_v16  ;;  %v276_v33 = vmul.f32 %v696_v21, %v660_v5  ;;  %v277_v35 = vmul.f32 %v697_v22, %v660_v5  ;;  %v280_v36 = vmul.f32 %v704_v25, %v660_v5 }
  0x15   : > { %v289_v19 = vadd.f32 %v661_v9, %v274_v13  ;;  %v290_v20 = vadd.f32 %v661_v9, %v275_v14  ;;  %v293_v23 = vadd.f32 %v661_v9, %v278_v17  ;;  %v294_v24 = vadd.f32 %v661_v9, %v279_v18  ;;  %772 = vmatprep.subr.bf16.mxu1 %v797_v16 }
  0x16   : > { %v281_v37 = vmul.f32 %v705_v26, %v660_v5  ;;  %v291_v39 = vadd.f32 %v661_v9, %v276_v33  ;;  %v292_v40 = vadd.f32 %v661_v9, %v277_v35  ;;  %v295_v41 = vadd.f32 %v661_v9, %v280_v36 }
  0x17   : > { %v297_v27 = vmax.f32 %v289_v19, 0.0  ;;  %v298_v28 = vmax.f32 %v290_v20, 0.0  ;;  %v301_v30 = vmax.f32 %v293_v23, 0.0  ;;  %v302_v31 = vmax.f32 %v294_v24, 0.0  ;;  %753 = vmatpush3.bf16.msra.mxu0 %v797_v16 }
  0x18   : > { %780 = vmatpush3.bf16.msra.mxu1 %v797_v16  ;;  %754 = vmatprep.subr.bf16.mxu0 %v798_v29  ;;  %v296_v42 = vadd.f32 %v661_v9, %v281_v37  ;;  %v299_v44 = vmax.f32 %v291_v39, 0.0  ;;  %v300_v45 = vmax.f32 %v292_v40, 0.0  ;;  %v303_v46 = vmax.f32 %v295_v41, 0.0 }
  0x19   : > { %v305_v32 = vpack.c.bf16 %v298_v28, %v297_v27  ;;  %v307_v34 = vpack.c.bf16 %v302_v31, %v301_v30  ;;  %773 = vmatprep.subr.bf16.mxu1 %v798_v29  ;;  %v501_v4 = vadd.s32 %v496_v56, %v492_v58  ;;  %v502_v5 = vadd.s32 %v496_v56, %v493_v59 }
  0x1a   : > { %v304_v47 = vmax.f32 %v296_v42, 0.0  ;;  %v306_v48 = vpack.c.bf16 %v300_v45, %v299_v44 }
  0x1b   : > { %760 = vmatprep.mubr.bf16.mxu0 %v305_v32  ;;  %764 = vmatprep.mubr.bf16.mxu1 %v307_v34  ;;  %vm509_vm6 = vcmp.lt.s32.totalorder %v501_v4, 200  ;;  %vm510_vm7 = vcmp.lt.s32.totalorder %v502_v5, 200  ;;  %v809_v32 = vmov (!%p679_p4), 0.0  }
  0x1c   : > { %755 = vmatpush3.bf16.msra.mxu0 %v798_v29  ;;  %781 = vmatpush3.bf16.msra.mxu1 %v798_v29  ;;  %v308_v49 = vpack.c.bf16 %v304_v47, %v303_v46  ;;  %541 = vst [vmem:[%s935_s5] sm:$0x1] (!%p679_p4), %v809_v32  ;;  %542 = vst [vmem:[%s936_s6] sm:$0x1] (!%p679_p4), %v809_v32 }
  0x1d   : > { %756 = vmatprep.subr.bf16.mxu0 %v799_v38  ;;  %774 = vmatprep.subr.bf16.mxu1 %v799_v38 }
  0x20   : > { %757 = vmatpush3.bf16.msra.mxu0 %v799_v38  ;;  %782 = vmatpush3.bf16.msra.mxu1 %v799_v38 }
  0x21   : > { %758 = vmatprep.subr.bf16.mxu0 %v800_v43  ;;  %775 = vmatprep.subr.bf16.mxu1 %v800_v43 }
  0x24   : > { %759 = vmatpush3.bf16.msra.mxu0 %v800_v43  ;;  %783 = vmatpush3.bf16.msra.mxu1 %v800_v43 }
  0x27   : > { %761 = vmatmul.mubr.bf16.vlgmr.msra.gmra.mrb[0].mxu0 %v306_v48  ;;  %765 = vmatmul.mubr.bf16.vlgmr.msra.gmra.mrb[0].mxu1 %v308_v49 }
  0xfa   : > { %v762_v2 = vpop.f32.mrb[0].mxu0  ;;  %v766_v3 = vpop.f32.mrb[0].mxu1 }
  0xfb   : > { %v407_v6 = vpop.f32.mrb[1].mxu0  ;;  %v423_v7 = vpop.f32.mrb[1].mxu1 }
  0xfc   : > { %v763_v8 = vpop.f32.mrb[2].mxu0  ;;  %v767_v9 = vpop.f32.mrb[2].mxu1  ;;  %540 = sbr.rel (%p679_p4) target bundleno = 259 (0x103), region = 40 }
  0xfd   : > { %v439_v10 = vpack.c.bf16 %v763_v8, %v762_v2  ;;  %v441_v11 = vpack.c.bf16 %v767_v9, %v766_v3  ;;  %v410_v12 = vpop.f32.mrb[3].mxu0  ;;  %v426_v13 = vpop.f32.mrb[3].mxu1 }
  0xfe   : > { %v438_v14 = vpack.c.bf16 %v410_v12, %v407_v6  ;;  %v440_v15 = vpack.c.bf16 %v426_v13, %v423_v7 }
  0xff   : > { %729 = vst [vmem:[%s248_s7 + $0x8] sm:$0xff] %v439_v10   ;;  %v480_v16 = vunpack.c.l.bf16 %v439_v10  ;;  %v481_v17 = vunpack.c.h.bf16 %v439_v10  ;;  %731 = vst [vmem:[%s248_s7 + $0x18] sm:$0xff] %v441_v11   ;;  %v484_v18 = vunpack.c.l.bf16 %v441_v11  ;;  %v485_v19 = vunpack.c.h.bf16 %v441_v11 }
 0x100   : > { %710 = vst [vmem:[%s248_s7] sm:$0xff] %v438_v14   ;;  %v478_v20 = vunpack.c.l.bf16 %v438_v14  ;;  %v479_v21 = vunpack.c.h.bf16 %v438_v14  ;;  %730 = vst [vmem:[%s248_s7 + $0x10] sm:$0xff] %v440_v15   ;;  %v482_v22 = vunpack.c.l.bf16 %v440_v15  ;;  %v483_v23 = vunpack.c.h.bf16 %v440_v15 }
 0x101   : > { %v531_v24 = vsel %vm507_vm0, %v480_v16, 0.0  ;;  %v532_v25 = vsel %vm508_vm1, %v481_v17, 0.0  ;;  %v535_v26 = vsel %vm511_vm2, %v484_v18, 0.0  ;;  %v536_v27 = vsel %vm512_vm3, %v485_v19, 0.0 }
 0x102   : > { %v529_v28 = vsel %vm505_vm4, %v478_v20, 0.0  ;;  %v530_v29 = vsel %vm506_vm5, %v479_v21, 0.0  ;;  %v533_v30 = vsel %vm509_vm6, %v482_v22, 0.0  ;;  %v534_v31 = vsel %vm510_vm7, %v483_v23, 0.0 }
 0x103 PF: > { %v544_v33 = vadd.f32 %v530_v29, %v529_v28  ;;  %v560_v34 = vmul.f32 %v529_v28, %v529_v28  ;;  %v561_v35 = vmul.f32 %v530_v29, %v530_v29  ;;  %v562_v36 = vmul.f32 %v531_v24, %v531_v24  ;;  %v543_v0 = vld [vmem:[%s935_s5] sm:$0x1] }
 0x104   : > { %v563_v38 = vmul.f32 %v532_v25, %v532_v25  ;;  %v564_v41 = vmul.f32 %v533_v30, %v533_v30  ;;  %v565_v44 = vmul.f32 %v534_v31, %v534_v31  ;;  %v566_v47 = vmul.f32 %v535_v26, %v535_v26  ;;  %v559_v3 = vld [vmem:[%s936_s6] sm:$0x1] }
 0x105   : > { %v545_v37 = vadd.f32 %v544_v33, %v531_v24  ;;  %v568_v39 = vadd.f32 %v561_v35, %v560_v34  ;;  %v567_v50 = vmul.f32 %v536_v27, %v536_v27 }
 0x107   : > { %v546_v40 = vadd.f32 %v545_v37, %v532_v25  ;;  %v569_v42 = vadd.f32 %v568_v39, %v562_v36 }
 0x109   : > { %v547_v43 = vadd.f32 %v546_v40, %v533_v30  ;;  %v570_v45 = vadd.f32 %v569_v42, %v563_v38 }
 0x10b   : > { %v548_v46 = vadd.f32 %v547_v43, %v534_v31  ;;  %v571_v48 = vadd.f32 %v570_v45, %v564_v41 }
 0x10d   : > { %v549_v49 = vadd.f32 %v548_v46, %v535_v26  ;;  %v572_v51 = vadd.f32 %v571_v48, %v565_v44 }
 0x10f   : > { %v550_v52 = vadd.f32 %v549_v49, %v536_v27  ;;  %v573_v53 = vadd.f32 %v572_v51, %v566_v47 }
 0x111   : > { %v551_v54 = vrot.slane %v550_v52, 4  ;;  %v574_v55 = vadd.f32 %v573_v53, %v567_v50 }
 0x113   : > { %v552_v56 = vadd.f32 %v551_v54, %v550_v52  ;;  %v575_v57 = vrot.slane %v574_v55, 4 }
 0x115   : > { %v553_v58 = vrot.slane %v552_v56, 2  ;;  %v576_v59 = vadd.f32 %v575_v57, %v574_v55 }
 0x117   : > { %v554_v60 = vadd.f32 %v553_v58, %v552_v56  ;;  %v577_v61 = vrot.slane %v576_v59, 2 }
 0x119   : > { %v555_v62 = vrot.slane %v554_v60, 1  ;;  %v578_v63 = vadd.f32 %v577_v61, %v576_v59 }
 0x11b   : > { %v556_v1 = vadd.f32 %v555_v62, %v554_v60  ;;  %v579_v2 = vrot.slane %v578_v63, 1 }
 0x11d   : > { %v557_v4 = vadd.f32 %v556_v1, %v543_v0  ;;  %v580_v5 = vadd.f32 %v579_v2, %v578_v63 }
 0x11f   : > { %558 = vst [vmem:[%s935_s5] sm:$0x1] %v557_v4  ;;  %v581_v6 = vadd.f32 %v580_v5, %v559_v3 }
 0x121   : > { %582 = vst [vmem:[%s936_s6] sm:$0x1] %v581_v6 }
 0x122 PF: > { %s17_s21 = sadd.s32 1, %s807_s21  }
 0x123   : > { %p14_p5 = scmp.ge.s32.totalorder %s17_s21, 6  }
 0x125   :  { %16 = sbr.rel (!%p14_p5) target bundleno = 1 (0x1), region = 86 }

// kernel: node_edge_forward.12
= control target key start
LH: loop header
LB: loop body
LE: loop exit
PB: predicated region body
PF: predicated region fallthrough
CT: control target
= control target key end

     0   :  { %s360_s12 = smov 0   ;;  %s387_s0 = inlined_call_operand.vmem [shape: bf16[256,128], index: 0, kind: input, shape index: {}]   ;;  %s388_s1 = inlined_call_operand.vmem [shape: f32[1,128], index: 1, kind: input, shape index: {}]   ;;  %s389_s2 = inlined_call_operand.vmem [shape: f32[1,128], index: 2, kind: input, shape index: {}]   ;;  %s390_s3 = inlined_call_operand.vmem [shape: f32[256,128], index: 3, kind: output, shape index: {}]  }
   0x1 LB: > { %s292_s13 = sadd.s32 4294967295, %s338_s12   ;;  %p296_p0 = scmp.ge.s32.totalorder %s338_s12, 1  ;;  %s338_s12 = sphi %s360_s12, %s13_s12  }
   0x2   : > { %p138_p1 = scmp.lt.s32.totalorder %s338_s12, 5 }
   0x4   : > { %p139_p2 = pnand %p296_p0, %p138_p1 }
   0x5   : > { %s297_s14 = sshll.u32 (!%p139_p2), %s292_s13, 3  ;;  %v301_v0 = vld [vmem:[%s388_s1] ss:$0 sm:$0xff] (!%p139_p2) }
   0x6   : > { %142 = sbr.rel (%p139_p2) target bundleno = 29 (0x1d), region = 32  ;;  %p163_p3 = scmp.lt.s32.totalorder (!%p139_p2), %s297_s14, 31  ;;  %v302_v9 = vld [vmem:[%s389_s2] ss:$0 sm:$0xff] (!%p139_p2) }
   0xd   : > { %s392_s14 = smov (!%p163_p3, %s297_s14), 31 }
   0xe   : > { %s298_s15 = sshll.u32 %s392_s14, 2  ;;  %s300_s23 = sshll.u32 %s392_s14, 3 }
   0xf   : > { %s166_s18 = scalar_lea.vmem %s387_s0, %s298_s15  ;;  %s172_s26 = scalar_lea.vmem %s390_s3, %s300_s23 }
  0x10   : > { %v306_v1 = vld [vmem:[%s166_s18] sm:$0xff]   ;;  %v321_v2 = vld [vmem:[%s166_s18 + $0x8] sm:$0xff]   ;;  %v322_v3 = vld [vmem:[%s166_s18 + $0x10] sm:$0xff]  }
  0x11   : > { %v307_v4 = vunpack.c.l.bf16 %v306_v1  ;;  %v308_v5 = vunpack.c.h.bf16 %v306_v1  ;;  %v311_v6 = vunpack.c.l.bf16 %v321_v2  ;;  %v312_v7 = vunpack.c.h.bf16 %v321_v2  ;;  %v323_v8 = vld [vmem:[%s166_s18 + $0x18] sm:$0xff]  }
  0x12   : > { %v315_v10 = vunpack.c.l.bf16 %v322_v3  ;;  %v316_v11 = vunpack.c.h.bf16 %v322_v3  ;;  %v319_v12 = vunpack.c.l.bf16 %v323_v8  ;;  %v320_v13 = vunpack.c.h.bf16 %v323_v8 }
  0x13   : > { %v197_v14 = vmul.f32 %v307_v4, %v301_v0  ;;  %v198_v15 = vmul.f32 %v308_v5, %v301_v0  ;;  %v199_v16 = vmul.f32 %v311_v6, %v301_v0  ;;  %v200_v17 = vmul.f32 %v312_v7, %v301_v0 }
  0x14   : > { %v201_v18 = vmul.f32 %v315_v10, %v301_v0  ;;  %v202_v19 = vmul.f32 %v316_v11, %v301_v0  ;;  %v203_v20 = vmul.f32 %v319_v12, %v301_v0  ;;  %v204_v21 = vmul.f32 %v320_v13, %v301_v0 }
  0x15   : > { %v212_v22 = vadd.f32 %v302_v9, %v197_v14  ;;  %v213_v23 = vadd.f32 %v302_v9, %v198_v15  ;;  %v214_v24 = vadd.f32 %v302_v9, %v199_v16  ;;  %v215_v25 = vadd.f32 %v302_v9, %v200_v17 }
  0x16   : > { %v216_v26 = vadd.f32 %v302_v9, %v201_v18  ;;  %v217_v27 = vadd.f32 %v302_v9, %v202_v19  ;;  %v218_v28 = vadd.f32 %v302_v9, %v203_v20  ;;  %v219_v29 = vadd.f32 %v302_v9, %v204_v21 }
  0x17   : > { %v220_v30 = vmax.f32 %v212_v22, 0.0  ;;  %v221_v31 = vmax.f32 %v213_v23, 0.0  ;;  %v222_v32 = vmax.f32 %v214_v24, 0.0  ;;  %v223_v33 = vmax.f32 %v215_v25, 0.0 }
  0x18   : > { %v224_v34 = vmax.f32 %v216_v26, 0.0  ;;  %v225_v35 = vmax.f32 %v217_v27, 0.0  ;;  %v226_v36 = vmax.f32 %v218_v28, 0.0  ;;  %v227_v37 = vmax.f32 %v219_v29, 0.0 }
  0x19   : > { %228 = vst [vmem:[%s172_s26] sm:$0xff] %v220_v30  ;;  %229 = vst [vmem:[%s172_s26 + $0x8] sm:$0xff] %v221_v31 }
  0x1a   : > { %230 = vst [vmem:[%s172_s26 + $0x10] sm:$0xff] %v222_v32  ;;  %231 = vst [vmem:[%s172_s26 + $0x18] sm:$0xff] %v223_v33 }
  0x1b   : > { %232 = vst [vmem:[%s172_s26 + $0x20] sm:$0xff] %v224_v34  ;;  %233 = vst [vmem:[%s172_s26 + $0x28] sm:$0xff] %v225_v35 }
  0x1c   : > { %234 = vst [vmem:[%s172_s26 + $0x30] sm:$0xff] %v226_v36  ;;  %235 = vst [vmem:[%s172_s26 + $0x38] sm:$0xff] %v227_v37 }
  0x1d PF: > { %s13_s12 = sadd.s32 1, %s338_s12  }
  0x1e   : > { %p10_p4 = scmp.ge.s32.totalorder %s13_s12, 6  }
  0x20   :  { %12 = sbr.rel (!%p10_p4) target bundleno = 1 (0x1), region = 62 }

// kernel: node_edge_forward.10
= control target key start
LH: loop header
LB: loop body
LE: loop exit
PB: predicated region body
PF: predicated region fallthrough
CT: control target
= control target key end

     0   :  { %s976_s29 = smov 0   ;;  %s1078_s0 = inlined_call_operand.vmem [shape: bf16[256,128], index: 0, kind: input, shape index: {}]   ;;  %s1079_s1 = inlined_call_operand.vmem [shape: f32[256,128], index: 1, kind: input, shape index: {}]   ;;  %s1080_s2 = inlined_call_operand.vmem [shape: f32[1,128], index: 2, kind: input, shape index: {}]   ;;  %s1081_s3 = inlined_call_operand.vmem [shape: f32[1,128], index: 3, kind: input, shape index: {}]   ;;  %s1082_s4 = inlined_call_operand.vmem [shape: bf16[128,128], index: 4, kind: input, shape index: {}]   ;;  %s1083_s5 = inlined_call_operand.<no memory space> [shape: f32[1,1], index: 5, kind: input, shape index: {}]   ;;  %s1084_s6 = inlined_call_operand.vmem [shape: bf16[256,128], index: 6, kind: output, shape index: {0}]   ;;  %s1085_s7 = inlined_call_operand.vmem [shape: f32[1,128], index: 7, kind: output, shape index: {1}]   ;;  %s1086_s8 = inlined_call_operand.vmem [shape: f32[1,128], index: 8, kind: output, shape index: {2}]  }
   0x1   :  { %14 = sst [smem:[#allocation2]] %s1083_s5 }
   0x2 LB: > { %s982_s30 = sadd.s32 4294967295, %s925_s29   ;;  %p771_p0 = scmp.ge.s32.totalorder %s925_s29, 1  ;;  %s925_s29 = sphi %s976_s29, %s20_s29  }
   0x3   : > { %p270_p1 = scmp.lt.s32.totalorder %s925_s29, 5 }
   0x5   : > { %p271_p2 = pnand %p771_p0, %p270_p1 }
   0x6   : > { %v911_v0 = vld [vmem:[%s1082_s4] sm:$0xff] (!%p271_p2)   ;;  %s772_s5 = sshll.u32 (!%p271_p2), %s982_s30, 3  ;;  %v912_v1 = vld [vmem:[%s1082_s4 + $0x8] sm:$0xff] (!%p271_p2)   ;;  %v913_v2 = vld [vmem:[%s1082_s4 + $0x10] sm:$0xff] (!%p271_p2)   ;;  %s1011_s24 = sld [smem:[#allocation2]] (!%p271_p2) }
   0x7   : > { %274 = sbr.rel (%p271_p2) target bundleno = 291 (0x123), region = 44  ;;  %p310_p3 = scmp.lt.s32.totalorder (!%p271_p2), %s772_s5, 31  ;;  %862 = vmatprep.subr.bf16.mxu0 (!%p271_p2), %v911_v0  ;;  %886 = vmatprep.subr.bf16.mxu1 (!%p271_p2), %v911_v0  ;;  %v914_v3 = vld [vmem:[%s1082_s4 + $0x18] sm:$0xff] (!%p271_p2)   ;;  %v778_v5 = vld [vmem:[%s1080_s2] ss:$0 sm:$0xff] (!%p271_p2)  ;;  %v916_v36 = vld [vmem:[%s1082_s4 + $0x28] sm:$0xff] (!%p271_p2)  }
   0x8   : > { %863 = vmatpush3.bf16.msra.mxu0 (!%p271_p2), %v911_v0  ;;  %894 = vmatpush3.bf16.msra.mxu1 (!%p271_p2), %v911_v0  ;;  %v779_v9 = vld [vmem:[%s1081_s3] ss:$0 sm:$0xff] (!%p271_p2)  ;;  %v917_v54 = vld [vmem:[%s1082_s4 + $0x30] sm:$0xff] (!%p271_p2)   ;;  %s796_s20 = sshll.u32 (!%p271_p2), %s982_s30, 6  ;;  %p797_p4 = scmp.ne.s32.totalorder (!%p271_p2), %s982_s30, 0 }
   0x9   : > { %864 = vmatprep.subr.bf16.mxu0 (!%p271_p2), %v912_v1  ;;  %887 = vmatprep.subr.bf16.mxu1 (!%p271_p2), %v912_v1  ;;  %v915_v18 = vld [vmem:[%s1082_s4 + $0x20] sm:$0xff] (!%p271_p2)  }
   0xc   : > { %865 = vmatpush3.bf16.msra.mxu0 (!%p271_p2), %v912_v1  ;;  %895 = vmatpush3.bf16.msra.mxu1 (!%p271_p2), %v912_v1  ;;  %s383_s12 = sadd.f32 (!%p271_p2), 1.0, %s1011_s24 }
   0xd   : > { %866 = vmatprep.subr.bf16.mxu0 (!%p271_p2), %v913_v2  ;;  %888 = vmatprep.subr.bf16.mxu1 (!%p271_p2), %v913_v2 }
   0xe   : > { %s1088_s5 = smov (!%p310_p3, %s772_s5), 31  ;;  %v392_v41 = vstv %s383_s12 }
   0xf   : > { %s773_s15 = sshll.u32 %s1088_s5, 2  ;;  %s775_s21 = sshll.u32 %s1088_s5, 3 }
  0x10   : > { %s313_s18 = scalar_lea.vmem %s1078_s0, %s773_s15  ;;  %867 = vmatpush3.bf16.msra.mxu0 %v913_v2  ;;  %896 = vmatpush3.bf16.msra.mxu1 %v913_v2  ;;  %s1019_s9 = scalar_lea.vmem %s1079_s1, %s775_s21 }
  0x11   : > { %v809_v4 = vld [vmem:[%s313_s18] sm:$0xff]   ;;  %v845_v8 = vld [vmem:[%s313_s18 + $0x10] sm:$0xff]   ;;  %v844_v12 = vld [vmem:[%s313_s18 + $0x8] sm:$0xff]   ;;  %868 = vmatprep.subr.bf16.mxu0 %v914_v3  ;;  %889 = vmatprep.subr.bf16.mxu1 %v914_v3  ;;  %s325_s23 = scalar_lea.vmem %s1084_s6, %s773_s15 }
  0x12   : > { %v810_v6 = vunpack.c.l.bf16 %v809_v4  ;;  %v811_v7 = vunpack.c.h.bf16 %v809_v4  ;;  %v818_v10 = vunpack.c.l.bf16 %v845_v8  ;;  %v819_v11 = vunpack.c.h.bf16 %v845_v8  ;;  %v846_v17 = vld [vmem:[%s313_s18 + $0x18] sm:$0xff]   ;;  %v384_v27 = vld [vmem:[%s1019_s9] sm:$0xff]  ;;  %v385_v32 = vld [vmem:[%s1019_s9 + $0x8] sm:$0xff] }
  0x13   : > { %v814_v15 = vunpack.c.l.bf16 %v844_v12  ;;  %v815_v16 = vunpack.c.h.bf16 %v844_v12  ;;  %v822_v21 = vunpack.c.l.bf16 %v846_v17  ;;  %v823_v22 = vunpack.c.h.bf16 %v846_v17  ;;  %v388_v33 = vld [vmem:[%s1019_s9 + $0x20] sm:$0xff]  ;;  %v389_v34 = vld [vmem:[%s1019_s9 + $0x28] sm:$0xff]  ;;  %v386_v49 = vld [vmem:[%s1019_s9 + $0x10] sm:$0xff] }
  0x14   : > { %v351_v13 = vmul.f32 %v810_v6, %v778_v5  ;;  %v352_v14 = vmul.f32 %v811_v7, %v778_v5  ;;  %v355_v19 = vmul.f32 %v818_v10, %v778_v5  ;;  %v356_v20 = vmul.f32 %v819_v11, %v778_v5  ;;  %869 = vmatpush3.bf16.msra.mxu0 %v914_v3  ;;  %v387_v50 = vld [vmem:[%s1019_s9 + $0x18] sm:$0xff]  ;;  %v390_v52 = vld [vmem:[%s1019_s9 + $0x30] sm:$0xff] }
  0x15   : > { %v353_v25 = vmul.f32 %v814_v15, %v778_v5  ;;  %v354_v26 = vmul.f32 %v815_v16, %v778_v5  ;;  %v357_v30 = vmul.f32 %v822_v21, %v778_v5  ;;  %v358_v31 = vmul.f32 %v823_v22, %v778_v5  ;;  %897 = vmatpush3.bf16.msra.mxu1 %v914_v3  ;;  %v391_v53 = vld [vmem:[%s1019_s9 + $0x38] sm:$0xff] }
  0x16   : > { %v366_v23 = vadd.f32 %v779_v9, %v351_v13  ;;  %v367_v24 = vadd.f32 %v779_v9, %v352_v14  ;;  %v370_v28 = vadd.f32 %v779_v9, %v355_v19  ;;  %v371_v29 = vadd.f32 %v779_v9, %v356_v20  ;;  %870 = vmatprep.subr.bf16.mxu0 %v915_v18  ;;  %v918_v4 = vld [vmem:[%s1082_s4 + $0x38] sm:$0xff]  }
  0x17   : > { %v368_v35 = vadd.f32 %v779_v9, %v353_v25  ;;  %890 = vmatprep.subr.bf16.mxu1 %v915_v18  ;;  %v369_v40 = vadd.f32 %v779_v9, %v354_v26  ;;  %v372_v43 = vadd.f32 %v779_v9, %v357_v30  ;;  %v373_v44 = vadd.f32 %v779_v9, %v358_v31 }
  0x18   : > { %v374_v37 = vmax.f32 %v366_v23, 0.0  ;;  %v375_v38 = vmax.f32 %v367_v24, 0.0  ;;  %v378_v39 = vmax.f32 %v370_v28, 0.0  ;;  %v379_v42 = vmax.f32 %v371_v29, 0.0  ;;  %871 = vmatpush3.bf16.msra.mxu0 %v915_v18 }
  0x19   : > { %v393_v45 = vmul.f32 %v392_v41, %v384_v27  ;;  %v394_v46 = vmul.f32 %v392_v41, %v385_v32  ;;  %v397_v47 = vmul.f32 %v392_v41, %v388_v33  ;;  %v398_v48 = vmul.f32 %v392_v41, %v389_v34  ;;  %898 = vmatpush3.bf16.msra.mxu1 %v915_v18 }
  0x1a   : > { %v376_v51 = vmax.f32 %v368_v35, 0.0  ;;  %872 = vmatprep.subr.bf16.mxu0 %v916_v36  ;;  %891 = vmatprep.subr.bf16.mxu1 %v916_v36  ;;  %v377_v58 = vmax.f32 %v369_v40, 0.0  ;;  %v395_v60 = vmul.f32 %v392_v41, %v386_v49  ;;  %v396_v61 = vmul.f32 %v392_v41, %v387_v50 }
  0x1b   : > { %v401_v55 = vadd.f32 %v393_v45, %v374_v37  ;;  %v402_v56 = vadd.f32 %v394_v46, %v375_v38  ;;  %v405_v57 = vadd.f32 %v397_v47, %v378_v39  ;;  %v406_v59 = vadd.f32 %v398_v48, %v379_v42 }
  0x1c   : > { %v380_v62 = vmax.f32 %v372_v43, 0.0  ;;  %v381_v0 = vmax.f32 %v373_v44, 0.0  ;;  %v399_v1 = vmul.f32 %v392_v41, %v390_v52  ;;  %v400_v2 = vmul.f32 %v392_v41, %v391_v53  ;;  %873 = vmatpush3.bf16.msra.mxu0 %v916_v36 }
  0x1d   : > { %v409_v63 = vpack.c.bf16 %v402_v56, %v401_v55  ;;  %899 = vmatpush3.bf16.msra.mxu1 %v916_v36  ;;  %v411_v3 = vpack.c.bf16 %v406_v59, %v405_v57  ;;  %874 = vmatprep.subr.bf16.mxu0 %v917_v54  ;;  %v403_v5 = vadd.f32 %v395_v60, %v376_v51  ;;  %v591_v11 = vlaneseq }
  0x1e   : > { %892 = vmatprep.subr.bf16.mxu1 %v917_v54  ;;  %v404_v6 = vadd.f32 %v396_v61, %v377_v58  ;;  %v407_v7 = vadd.f32 %v399_v1, %v380_v62  ;;  %v408_v8 = vadd.f32 %v400_v2, %v381_v0  ;;  %v600_v17 = vstv %s796_s20 }
  0x1f   : > { %878 = vmatprep.mubr.bf16.mxu0 %v409_v63  ;;  %882 = vmatprep.mubr.bf16.mxu1 %v411_v3  ;;  %v592_v12 = vshrl.u32 %v591_v11, 7  ;;  %v927_v57 = vmov (!%p797_p4), 0.0  }
  0x20   : > { %875 = vmatpush3.bf16.msra.mxu0 %v917_v54  ;;  %v410_v9 = vpack.c.bf16 %v404_v6, %v403_v5  ;;  %v412_v10 = vpack.c.bf16 %v408_v8, %v407_v7  ;;  %645 = vst [vmem:[%s1085_s7] sm:$0x1] (!%p797_p4), %v927_v57  ;;  %646 = vst [vmem:[%s1086_s8] sm:$0x1] (!%p797_p4), %v927_v57 }
  0x21   : > { %900 = vmatpush3.bf16.msra.mxu1 %v917_v54  ;;  %876 = vmatprep.subr.bf16.mxu0 %v918_v4  ;;  %v594_v13 = vadd.s32 16, %v592_v12  ;;  %v595_v14 = vadd.s32 24, %v592_v12  ;;  %v598_v15 = vadd.s32 48, %v592_v12  ;;  %v599_v16 = vadd.s32 56, %v592_v12 }
  0x22   : > { %893 = vmatprep.subr.bf16.mxu1 %v918_v4  ;;  %v593_v18 = vadd.s32 8, %v592_v12  ;;  %v596_v19 = vadd.s32 32, %v592_v12  ;;  %v597_v20 = vadd.s32 40, %v592_v12  ;;  %v601_v25 = vadd.s32 %v600_v17, %v592_v12 }
  0x23   : > { %v603_v21 = vadd.s32 %v600_v17, %v594_v13  ;;  %v604_v22 = vadd.s32 %v600_v17, %v595_v14  ;;  %v607_v23 = vadd.s32 %v600_v17, %v598_v15  ;;  %v608_v24 = vadd.s32 %v600_v17, %v599_v16 }
  0x24   : > { %877 = vmatpush3.bf16.msra.mxu0 %v918_v4  ;;  %v602_v26 = vadd.s32 %v600_v17, %v593_v18  ;;  %v605_v29 = vadd.s32 %v600_v17, %v596_v19  ;;  %v606_v30 = vadd.s32 %v600_v17, %v597_v20  ;;  %vm609_vm4 = vcmp.lt.s32.totalorder %v601_v25, 200 }
  0x25   : > { %901 = vmatpush3.bf16.msra.mxu1 %v918_v4  ;;  %vm611_vm0 = vcmp.lt.s32.totalorder %v603_v21, 200  ;;  %vm612_vm1 = vcmp.lt.s32.totalorder %v604_v22, 200  ;;  %vm615_vm2 = vcmp.lt.s32.totalorder %v607_v23, 200  ;;  %vm616_vm3 = vcmp.lt.s32.totalorder %v608_v24, 200 }
  0x26   : > { %vm610_vm5 = vcmp.lt.s32.totalorder %v602_v26, 200  ;;  %vm613_vm6 = vcmp.lt.s32.totalorder %v605_v29, 200  ;;  %vm614_vm7 = vcmp.lt.s32.totalorder %v606_v30, 200 }
  0x27   : > { %879 = vmatmul.mubr.bf16.vlgmr.msra.gmra.mrb[0].mxu0 %v410_v9 }
  0x28   : > { %883 = vmatmul.mubr.bf16.vlgmr.msra.gmra.mrb[0].mxu1 %v412_v10 }
  0xfa   : > { %v880_v27 = vpop.f32.mrb[0].mxu0 }
  0xfb   : > { %v884_v28 = vpop.f32.mrb[0].mxu1  ;;  %v511_v31 = vpop.f32.mrb[1].mxu0 }
  0xfc   : > { %v527_v32 = vpop.f32.mrb[1].mxu1  ;;  %v881_v33 = vpop.f32.mrb[2].mxu0 }
  0xfd   : > { %v885_v34 = vpop.f32.mrb[2].mxu1  ;;  %v543_v35 = vpack.c.bf16 %v881_v33, %v880_v27  ;;  %v514_v37 = vpop.f32.mrb[3].mxu0  ;;  %644 = sbr.rel (%p797_p4) target bundleno = 260 (0x104), region = 48 }
  0xfe   : > { %v545_v36 = vpack.c.bf16 %v885_v34, %v884_v28  ;;  %v530_v38 = vpop.f32.mrb[3].mxu1  ;;  %v542_v39 = vpack.c.bf16 %v514_v37, %v511_v31 }
  0xff   : > { %v544_v40 = vpack.c.bf16 %v530_v38, %v527_v32  ;;  %847 = vst [vmem:[%s325_s23 + $0x8] sm:$0xff] %v543_v35   ;;  %v584_v41 = vunpack.c.l.bf16 %v543_v35  ;;  %v585_v42 = vunpack.c.h.bf16 %v543_v35 }
 0x100   : > { %849 = vst [vmem:[%s325_s23 + $0x18] sm:$0xff] %v545_v36   ;;  %v588_v43 = vunpack.c.l.bf16 %v545_v36  ;;  %v589_v44 = vunpack.c.h.bf16 %v545_v36  ;;  %828 = vst [vmem:[%s325_s23] sm:$0xff] %v542_v39   ;;  %v582_v45 = vunpack.c.l.bf16 %v542_v39  ;;  %v583_v46 = vunpack.c.h.bf16 %v542_v39 }
 0x101   : > { %848 = vst [vmem:[%s325_s23 + $0x10] sm:$0xff] %v544_v40   ;;  %v586_v47 = vunpack.c.l.bf16 %v544_v40  ;;  %v587_v48 = vunpack.c.h.bf16 %v544_v40  ;;  %v635_v49 = vsel %vm611_vm0, %v584_v41, 0.0  ;;  %v636_v50 = vsel %vm612_vm1, %v585_v42, 0.0 }
 0x102   : > { %v639_v51 = vsel %vm615_vm2, %v588_v43, 0.0  ;;  %v640_v52 = vsel %vm616_vm3, %v589_v44, 0.0  ;;  %v633_v53 = vsel %vm609_vm4, %v582_v45, 0.0  ;;  %v634_v54 = vsel %vm610_vm5, %v583_v46, 0.0 }
 0x103   : > { %v637_v55 = vsel %vm613_vm6, %v586_v47, 0.0  ;;  %v638_v56 = vsel %vm614_vm7, %v587_v48, 0.0 }
 0x104 PF: > { %v648_v58 = vadd.f32 %v634_v54, %v633_v53  ;;  %v664_v59 = vmul.f32 %v633_v53, %v633_v53  ;;  %v665_v60 = vmul.f32 %v634_v54, %v634_v54  ;;  %v666_v61 = vmul.f32 %v635_v49, %v635_v49  ;;  %v647_v25 = vld [vmem:[%s1085_s7] sm:$0x1] }
 0x105   : > { %v667_v63 = vmul.f32 %v636_v50, %v636_v50  ;;  %v668_v2 = vmul.f32 %v637_v55, %v637_v55  ;;  %v669_v5 = vmul.f32 %v638_v56, %v638_v56  ;;  %v670_v8 = vmul.f32 %v639_v51, %v639_v51  ;;  %v663_v28 = vld [vmem:[%s1086_s8] sm:$0x1] }
 0x106   : > { %v649_v62 = vadd.f32 %v648_v58, %v635_v49  ;;  %v672_v0 = vadd.f32 %v665_v60, %v664_v59  ;;  %v671_v11 = vmul.f32 %v640_v52, %v640_v52 }
 0x108   : > { %v650_v1 = vadd.f32 %v649_v62, %v636_v50  ;;  %v673_v3 = vadd.f32 %v672_v0, %v666_v61 }
 0x10a   : > { %v651_v4 = vadd.f32 %v650_v1, %v637_v55  ;;  %v674_v6 = vadd.f32 %v673_v3, %v667_v63 }
 0x10c   : > { %v652_v7 = vadd.f32 %v651_v4, %v638_v56  ;;  %v675_v9 = vadd.f32 %v674_v6, %v668_v2 }
 0x10e   : > { %v653_v10 = vadd.f32 %v652_v7, %v639_v51  ;;  %v676_v12 = vadd.f32 %v675_v9, %v669_v5 }
 0x110   : > { %v654_v13 = vadd.f32 %v653_v10, %v640_v52  ;;  %v677_v14 = vadd.f32 %v676_v12, %v670_v8 }
 0x112   : > { %v655_v15 = vrot.slane %v654_v13, 4  ;;  %v678_v16 = vadd.f32 %v677_v14, %v671_v11 }
 0x114   : > { %v656_v17 = vadd.f32 %v655_v15, %v654_v13  ;;  %v679_v18 = vrot.slane %v678_v16, 4 }
 0x116   : > { %v657_v19 = vrot.slane %v656_v17, 2  ;;  %v680_v20 = vadd.f32 %v679_v18, %v678_v16 }
 0x118   : > { %v658_v21 = vadd.f32 %v657_v19, %v656_v17  ;;  %v681_v22 = vrot.slane %v680_v20, 2 }
 0x11a   : > { %v659_v23 = vrot.slane %v658_v21, 1  ;;  %v682_v24 = vadd.f32 %v681_v22, %v680_v20 }
 0x11c   : > { %v660_v26 = vadd.f32 %v659_v23, %v658_v21  ;;  %v683_v27 = vrot.slane %v682_v24, 1 }
 0x11e   : > { %v661_v29 = vadd.f32 %v660_v26, %v647_v25  ;;  %v684_v30 = vadd.f32 %v683_v27, %v682_v24 }
 0x120   : > { %662 = vst [vmem:[%s1085_s7] sm:$0x1] %v661_v29  ;;  %v685_v31 = vadd.f32 %v684_v30, %v663_v28 }
 0x122   : > { %686 = vst [vmem:[%s1086_s8] sm:$0x1] %v685_v31 }
 0x123 PF: > { %s20_s29 = sadd.s32 1, %s925_s29  }
 0x124   : > { %p17_p5 = scmp.ge.s32.totalorder %s20_s29, 6  }
 0x126   :  { %19 = sbr.rel (!%p17_p5) target bundleno = 2 (0x2), region = 97 }

// kernel: node_edge_forward.13
= control target key start
LH: loop header
LB: loop body
LE: loop exit
PB: predicated region body
PF: predicated region fallthrough
CT: control target
= control target key end

     0   :  { %s981_s26 = smov 0   ;;  %s1080_s0 = inlined_call_operand.vmem [shape: f32[256,128], index: 0, kind: input, shape index: {}]   ;;  %s1081_s1 = inlined_call_operand.vmem [shape: f32[256,128], index: 1, kind: input, shape index: {}]   ;;  %s1082_s2 = inlined_call_operand.vmem [shape: f32[256,1], index: 2, kind: input, shape index: {}]   ;;  %s1083_s3 = inlined_call_operand.vmem [shape: bf16[128,128], index: 3, kind: input, shape index: {}]   ;;  %s1084_s4 = inlined_call_operand.<no memory space> [shape: f32[1,1], index: 4, kind: input, shape index: {}]   ;;  %s1085_s5 = inlined_call_operand.vmem [shape: bf16[256,128], index: 5, kind: output, shape index: {0}]   ;;  %s1086_s6 = inlined_call_operand.vmem [shape: f32[1,128], index: 6, kind: output, shape index: {1}]   ;;  %s1087_s7 = inlined_call_operand.vmem [shape: f32[1,128], index: 7, kind: output, shape index: {2}]  }
   0x1   :  { %13 = sst [smem:[#allocation2]] %s1084_s4 }
   0x2 LB: > { %s987_s27 = sadd.s32 4294967295, %s934_s26   ;;  %p796_p0 = scmp.ge.s32.totalorder %s934_s26, 1  ;;  %s934_s26 = sphi %s981_s26, %s19_s26  }
   0x3   : > { %p256_p1 = scmp.lt.s32.totalorder %s934_s26, 5 }
   0x5   : > { %p257_p2 = pnand %p796_p0, %p256_p1 }
   0x6   : > { %s797_s28 = sshll.u32 (!%p257_p2), %s987_s27, 3  ;;  %v936_v0 = vmov (!%p257_p2), 0   ;;  %v920_v1 = vld [vmem:[%s1083_s3] sm:$0xff] (!%p257_p2)   ;;  %v921_v2 = vld [vmem:[%s1083_s3 + $0x8] sm:$0xff] (!%p257_p2)   ;;  %v922_v3 = vld [vmem:[%s1083_s3 + $0x10] sm:$0xff] (!%p257_p2)   ;;  %s331_s25 = sld [smem:[#allocation2]] (!%p257_p2) }
   0x7   : > { %260 = sbr.rel (%p257_p2) target bundleno = 416 (0x1a0), region = 40  ;;  %919 = vset.pattern.permute.xlu1 (!%p257_p2), %v936_v0  ;;  %918 = vset.pattern.permute.xlu0 (!%p257_p2), %v936_v0  ;;  %p299_p3 = scmp.lt.s32.totalorder (!%p257_p2), %s797_s28, 31  ;;  %v923_v8 = vld [vmem:[%s1083_s3 + $0x18] sm:$0xff] (!%p257_p2)   ;;  %v924_v11 = vld [vmem:[%s1083_s3 + $0x20] sm:$0xff] (!%p257_p2)   ;;  %v925_v14 = vld [vmem:[%s1083_s3 + $0x28] sm:$0xff] (!%p257_p2)  }
   0x8   : > { %868 = vmatprep.subr.bf16.mxu0 (!%p257_p2), %v920_v1  ;;  %892 = vmatprep.subr.bf16.mxu1 (!%p257_p2), %v920_v1  ;;  %v926_v15 = vld [vmem:[%s1083_s3 + $0x30] sm:$0xff] (!%p257_p2)   ;;  %v927_v16 = vld [vmem:[%s1083_s3 + $0x38] sm:$0xff] (!%p257_p2)   ;;  %p822_p4 = scmp.ne.s32.totalorder (!%p257_p2), %s987_s27, 0 }
   0x9   : > { %869 = vmatpush3.bf16.msra.mxu0 (!%p257_p2), %v920_v1  ;;  %900 = vmatpush3.bf16.msra.mxu1 (!%p257_p2), %v920_v1 }
   0xa   : > { %870 = vmatprep.subr.bf16.mxu0 (!%p257_p2), %v921_v2  ;;  %893 = vmatprep.subr.bf16.mxu1 (!%p257_p2), %v921_v2 }
   0xc   : > { %s332_s4 = sadd.f32 (!%p257_p2), 1.0, %s331_s25 }
   0xd   : > { %871 = vmatpush3.bf16.msra.mxu0 (!%p257_p2), %v921_v2  ;;  %901 = vmatpush3.bf16.msra.mxu1 (!%p257_p2), %v921_v2 }
   0xe   : > { %s1089_s28 = smov (!%p299_p3, %s797_s28), 31  ;;  %872 = vmatprep.subr.bf16.mxu0 %v922_v3  ;;  %894 = vmatprep.subr.bf16.mxu1 %v922_v3  ;;  %v333_v17 = vstv %s332_s4 }
   0xf   : > { %s1001_s9 = sshll.u32 %s1089_s28, 3  ;;  %s804_s13 = sshll.u32 %s1089_s28, 2 }
  0x10   : > { %s314_s14 = scalar_lea.vmem %s1082_s2, %s1001_s9  ;;  %s302_s8 = scalar_lea.vmem %s1080_s0, %s1001_s9 }
  0x11   : > { %v362_v4 = vld [vmem:[%s314_s14 + $0x20] sm:$0xff]  ;;  %v363_v6 = vld [vmem:[%s314_s14 + $0x28] sm:$0xff]  ;;  %v361_v9 = vld [vmem:[%s314_s14 + $0x18] sm:$0xff]  ;;  %873 = vmatpush3.bf16.msra.mxu0 %v922_v3  ;;  %902 = vmatpush3.bf16.msra.mxu1 %v922_v3  ;;  %s1033_s12 = scalar_lea.vmem %s1081_s1, %s1001_s9  ;;  %s821_s9 = sshll.u32 %s987_s27, 6 }
  0x12   : > { %v358_v5 = vld [vmem:[%s314_s14] sm:$0xff]  ;;  %388 = vperm.xlu1 %919, %v362_v4   ;;  %v359_v7 = vld [vmem:[%s314_s14 + $0x8] sm:$0xff]  ;;  %v360_v10 = vld [vmem:[%s314_s14 + $0x10] sm:$0xff]  ;;  %874 = vmatprep.subr.bf16.mxu0 %v923_v8  ;;  %s1048_s16 = scalar_lea.vmem %s1085_s5, %s804_s13 }
  0x13   : > { %368 = vperm.xlu0 %918, %v358_v5   ;;  %895 = vmatprep.subr.bf16.mxu1 %v923_v8  ;;  %v365_v12 = vld [vmem:[%s314_s14 + $0x38] sm:$0xff]  ;;  %v364_v13 = vld [vmem:[%s314_s14 + $0x30] sm:$0xff]  ;;  %v327_v18 = vld [vmem:[%s302_s8 + $0x20] sm:$0xff] }
  0x14   : > { %v323_v19 = vld [vmem:[%s302_s8] sm:$0xff]  ;;  %v328_v20 = vld [vmem:[%s302_s8 + $0x28] sm:$0xff]  ;;  %v338_v22 = vmul.f32 %v333_v17, %v327_v18  ;;  %v326_v27 = vld [vmem:[%s302_s8 + $0x18] sm:$0xff] }
  0x15   : > { %875 = vmatpush3.bf16.msra.mxu0 %v923_v8  ;;  %903 = vmatpush3.bf16.msra.mxu1 %v923_v8  ;;  %v324_v21 = vld [vmem:[%s302_s8 + $0x8] sm:$0xff]  ;;  %v334_v23 = vmul.f32 %v333_v17, %v323_v19  ;;  %v342_v24 = vld [vmem:[%s1033_s12] sm:$0xff]  ;;  %v339_v25 = vmul.f32 %v333_v17, %v328_v20  ;;  %v325_v28 = vld [vmem:[%s302_s8 + $0x10] sm:$0xff]  ;;  %v337_v34 = vmul.f32 %v333_v17, %v326_v27 }
  0x16   : > { %393 = vperm.xlu1 %919, %v363_v6   ;;  %876 = vmatprep.subr.bf16.mxu0 %v924_v11  ;;  %v335_v26 = vmul.f32 %v333_v17, %v324_v21  ;;  %v346_v29 = vld [vmem:[%s1033_s12 + $0x20] sm:$0xff]  ;;  %v343_v32 = vld [vmem:[%s1033_s12 + $0x8] sm:$0xff]  ;;  %v345_v35 = vld [vmem:[%s1033_s12 + $0x18] sm:$0xff]  ;;  %v336_v36 = vmul.f32 %v333_v17, %v325_v28 }
  0x17   : > { %373 = vperm.xlu0 %918, %v359_v7   ;;  %896 = vmatprep.subr.bf16.mxu1 %v924_v11  ;;  %v347_v33 = vld [vmem:[%s1033_s12 + $0x28] sm:$0xff]  ;;  %v350_v37 = vadd.f32 %v342_v24, %v334_v23  ;;  %v354_v38 = vadd.f32 %v346_v29, %v338_v22  ;;  %v344_v41 = vld [vmem:[%s1033_s12 + $0x10] sm:$0xff]  ;;  %v330_v44 = vld [vmem:[%s302_s8 + $0x38] sm:$0xff]  ;;  %v353_v50 = vadd.f32 %v345_v35, %v337_v34 }
  0x18   : > { %v351_v42 = vadd.f32 %v343_v32, %v335_v26  ;;  %v355_v43 = vadd.f32 %v347_v33, %v339_v25  ;;  %v329_v45 = vld [vmem:[%s302_s8 + $0x30] sm:$0xff]  ;;  %v352_v51 = vadd.f32 %v344_v41, %v336_v36  ;;  %v341_v52 = vmul.f32 %v333_v17, %v330_v44  ;;  %v349_v58 = vld [vmem:[%s1033_s12 + $0x38] sm:$0xff] }
  0x19   : > { %877 = vmatpush3.bf16.msra.mxu0 %v924_v11  ;;  %904 = vmatpush3.bf16.msra.mxu1 %v924_v11  ;;  %v340_v53 = vmul.f32 %v333_v17, %v329_v45  ;;  %v348_v61 = vld [vmem:[%s1033_s12 + $0x30] sm:$0xff] }
  0x1a   : > { %383 = vperm.xlu1 %919, %v361_v9   ;;  %878 = vmatprep.subr.bf16.mxu0 %v925_v14  ;;  %v357_v2 = vadd.f32 %v349_v58, %v341_v52 }
  0x1b   : > { %378 = vperm.xlu0 %918, %v360_v10   ;;  %897 = vmatprep.subr.bf16.mxu1 %v925_v14  ;;  %v356_v5 = vadd.f32 %v348_v61, %v340_v53 }
  0x1d   : > { %879 = vmatpush3.bf16.msra.mxu0 %v925_v14  ;;  %905 = vmatpush3.bf16.msra.mxu1 %v925_v14  ;;  %v604_v14 = vlaneseq }
  0x1e   : > { %403 = vperm.xlu1 %919, %v365_v12   ;;  %880 = vmatprep.subr.bf16.mxu0 %v926_v15 }
  0x1f   : > { %398 = vperm.xlu0 %918, %v364_v13   ;;  %898 = vmatprep.subr.bf16.mxu1 %v926_v15 }
  0x21   : > { %881 = vmatpush3.bf16.msra.mxu0 %v926_v15  ;;  %906 = vmatpush3.bf16.msra.mxu1 %v926_v15  ;;  %v605_v15 = vshrl.u32 %v604_v14, 7 }
  0x22   : > { %882 = vmatprep.subr.bf16.mxu0 %v927_v16  ;;  %899 = vmatprep.subr.bf16.mxu1 %v927_v16 }
  0x23   : > { %v608_v17 = vadd.s32 24, %v605_v15  ;;  %v611_v22 = vadd.s32 48, %v605_v15  ;;  %v612_v26 = vadd.s32 56, %v605_v15  ;;  %v610_v29 = vadd.s32 40, %v605_v15 }
  0x25   : > { %883 = vmatpush3.bf16.msra.mxu0 %v927_v16  ;;  %907 = vmatpush3.bf16.msra.mxu1 %v927_v16  ;;  %v607_v16 = vadd.s32 16, %v605_v15 }
  0x91   : > { %v389_v30 = vpop.permute.xlu1 %388 }
  0x92   : > { %v369_v31 = vpop.permute.xlu0 %368  ;;  %v410_v39 = vmul.f32 %v389_v30, %v327_v18  ;;  %v613_v18 = vstv %s821_s9 }
  0x93   : > { %v406_v40 = vmul.f32 %v369_v31, %v323_v19  ;;  %v606_v19 = vadd.s32 8, %v605_v15  ;;  %v614_v24 = vadd.s32 %v613_v18, %v605_v15  ;;  %v620_v33 = vadd.s32 %v613_v18, %v611_v22 }
  0x94   : > { %v418_v56 = vsub.f32 %v354_v38, %v410_v39  ;;  %v621_v36 = vadd.s32 %v613_v18, %v612_v26  ;;  %v619_v41 = vadd.s32 %v613_v18, %v610_v29 }
  0x95   : > { %v394_v46 = vpop.permute.xlu1 %393  ;;  %v414_v54 = vsub.f32 %v350_v37, %v406_v40  ;;  %v615_v25 = vadd.s32 %v613_v18, %v606_v19  ;;  %vm622_vm2 = vcmp.lt.s32.totalorder %v614_v24, 200  ;;  %vm628_vm4 = vcmp.lt.s32.totalorder %v620_v33, 200 }
  0x96   : > { %v374_v47 = vpop.permute.xlu0 %373  ;;  %v411_v48 = vmul.f32 %v394_v46, %v328_v20  ;;  %v616_v20 = vadd.s32 %v613_v18, %v607_v16  ;;  %vm629_vm5 = vcmp.lt.s32.totalorder %v621_v36, 200  ;;  %vm627_vm7 = vcmp.lt.s32.totalorder %v619_v41, 200 }
  0x97   : > { %v407_v49 = vmul.f32 %v374_v47, %v324_v21  ;;  %v617_v21 = vadd.s32 %v613_v18, %v608_v17  ;;  %vm623_vm3 = vcmp.lt.s32.totalorder %v615_v25, 200 }
  0x98   : > { %v419_v57 = vsub.f32 %v355_v43, %v411_v48  ;;  %vm624_vm0 = vcmp.lt.s32.totalorder %v616_v20, 200 }
  0x99   : > { %v415_v55 = vsub.f32 %v351_v42, %v407_v49  ;;  %v384_v59 = vpop.permute.xlu1 %383  ;;  %vm625_vm1 = vcmp.lt.s32.totalorder %v617_v21, 200 }
  0x9a   : > { %v379_v60 = vpop.permute.xlu0 %378  ;;  %v409_v62 = vmul.f32 %v384_v59, %v326_v27  ;;  %v424_v1 = vpack.c.bf16 %v419_v57, %v418_v56 }
  0x9b   : > { %v408_v63 = vmul.f32 %v379_v60, %v325_v28  ;;  %v422_v0 = vpack.c.bf16 %v415_v55, %v414_v54  ;;  %v609_v28 = vadd.s32 32, %v605_v15  ;;  %v937_v60 = vmov (!%p822_p4), 0.0  }
  0x9c   : > { %v417_v3 = vsub.f32 %v353_v50, %v409_v62  ;;  %888 = vmatprep.mubr.bf16.mxu1 %v424_v1  ;;  %658 = vst [vmem:[%s1086_s6] sm:$0x1] (!%p822_p4), %v937_v60  ;;  %659 = vst [vmem:[%s1087_s7] sm:$0x1] (!%p822_p4), %v937_v60 }
  0x9d   : > { %v416_v4 = vsub.f32 %v352_v51, %v408_v63  ;;  %884 = vmatprep.mubr.bf16.mxu0 %v422_v0  ;;  %v404_v6 = vpop.permute.xlu1 %403  ;;  %v618_v40 = vadd.s32 %v613_v18, %v609_v28 }
  0x9e   : > { %v399_v7 = vpop.permute.xlu0 %398  ;;  %v413_v8 = vmul.f32 %v404_v6, %v330_v44 }
  0x9f   : > { %v412_v9 = vmul.f32 %v399_v7, %v329_v45  ;;  %v423_v10 = vpack.c.bf16 %v417_v3, %v416_v4  ;;  %vm626_vm6 = vcmp.lt.s32.totalorder %v618_v40, 200 }
  0xa0   : > { %v421_v11 = vsub.f32 %v357_v2, %v413_v8 }
  0xa1   : > { %v420_v12 = vsub.f32 %v356_v5, %v412_v9  ;;  %885 = vmatmul.mubr.bf16.vlgmr.msra.gmra.mrb[0].mxu0 %v423_v10 }
  0xa3   : > { %v425_v13 = vpack.c.bf16 %v421_v11, %v420_v12 }
  0xa5   : > { %889 = vmatmul.mubr.bf16.vlgmr.msra.gmra.mrb[0].mxu1 %v425_v13 }
 0x174   : > { %v886_v23 = vpop.f32.mrb[0].mxu0 }
 0x175   : > { %v524_v27 = vpop.f32.mrb[1].mxu0 }
 0x176   : > { %v887_v30 = vpop.f32.mrb[2].mxu0 }
 0x177   : > { %v556_v31 = vpack.c.bf16 %v887_v30, %v886_v23  ;;  %v527_v32 = vpop.f32.mrb[3].mxu0 }
 0x178   : > { %v555_v34 = vpack.c.bf16 %v527_v32, %v524_v27  ;;  %v890_v35 = vpop.f32.mrb[0].mxu1 }
 0x179   : > { %853 = vst [vmem:[%s1048_s16 + $0x8] sm:$0xff] %v556_v31   ;;  %v597_v37 = vunpack.c.l.bf16 %v556_v31  ;;  %v598_v38 = vunpack.c.h.bf16 %v556_v31  ;;  %v540_v39 = vpop.f32.mrb[1].mxu1 }
 0x17a   : > { %837 = vst [vmem:[%s1048_s16] sm:$0xff] %v555_v34   ;;  %v595_v42 = vunpack.c.l.bf16 %v555_v34  ;;  %v596_v43 = vunpack.c.h.bf16 %v555_v34  ;;  %v891_v44 = vpop.f32.mrb[2].mxu1  ;;  %657 = sbr.rel (%p822_p4) target bundleno = 385 (0x181), region = 44 }
 0x17b   : > { %v648_v45 = vsel %vm624_vm0, %v597_v37, 0.0  ;;  %v649_v46 = vsel %vm625_vm1, %v598_v38, 0.0  ;;  %v558_v47 = vpack.c.bf16 %v891_v44, %v890_v35  ;;  %v543_v48 = vpop.f32.mrb[3].mxu1 }
 0x17c   : > { %v646_v49 = vsel %vm622_vm2, %v595_v42, 0.0  ;;  %v647_v50 = vsel %vm623_vm3, %v596_v43, 0.0  ;;  %v557_v51 = vpack.c.bf16 %v543_v48, %v540_v39 }
 0x17d   : > { %855 = vst [vmem:[%s1048_s16 + $0x18] sm:$0xff] %v558_v47   ;;  %v601_v52 = vunpack.c.l.bf16 %v558_v47  ;;  %v602_v53 = vunpack.c.h.bf16 %v558_v47 }
 0x17e   : > { %854 = vst [vmem:[%s1048_s16 + $0x10] sm:$0xff] %v557_v51   ;;  %v599_v54 = vunpack.c.l.bf16 %v557_v51  ;;  %v600_v55 = vunpack.c.h.bf16 %v557_v51 }
 0x17f   : > { %v652_v56 = vsel %vm628_vm4, %v601_v52, 0.0  ;;  %v653_v57 = vsel %vm629_vm5, %v602_v53, 0.0 }
 0x180   : > { %v650_v58 = vsel %vm626_vm6, %v599_v54, 0.0  ;;  %v651_v59 = vsel %vm627_vm7, %v600_v55, 0.0 }
 0x181 PF: > { %v661_v61 = vadd.f32 %v647_v50, %v646_v49  ;;  %v677_v62 = vmul.f32 %v646_v49, %v646_v49  ;;  %v678_v63 = vmul.f32 %v647_v50, %v647_v50  ;;  %v679_v0 = vmul.f32 %v648_v45, %v648_v45  ;;  %v660_v28 = vld [vmem:[%s1086_s6] sm:$0x1] }
 0x182   : > { %v680_v2 = vmul.f32 %v649_v46, %v649_v46  ;;  %v681_v5 = vmul.f32 %v650_v58, %v650_v58  ;;  %v682_v8 = vmul.f32 %v651_v59, %v651_v59  ;;  %v683_v11 = vmul.f32 %v652_v56, %v652_v56  ;;  %v676_v31 = vld [vmem:[%s1087_s7] sm:$0x1] }
 0x183   : > { %v662_v1 = vadd.f32 %v661_v61, %v648_v45  ;;  %v685_v3 = vadd.f32 %v678_v63, %v677_v62  ;;  %v684_v14 = vmul.f32 %v653_v57, %v653_v57 }
 0x185   : > { %v663_v4 = vadd.f32 %v662_v1, %v649_v46  ;;  %v686_v6 = vadd.f32 %v685_v3, %v679_v0 }
 0x187   : > { %v664_v7 = vadd.f32 %v663_v4, %v650_v58  ;;  %v687_v9 = vadd.f32 %v686_v6, %v680_v2 }
 0x189   : > { %v665_v10 = vadd.f32 %v664_v7, %v651_v59  ;;  %v688_v12 = vadd.f32 %v687_v9, %v681_v5 }
 0x18b   : > { %v666_v13 = vadd.f32 %v665_v10, %v652_v56  ;;  %v689_v15 = vadd.f32 %v688_v12, %v682_v8 }
 0x18d   : > { %v667_v16 = vadd.f32 %v666_v13, %v653_v57  ;;  %v690_v17 = vadd.f32 %v689_v15, %v683_v11 }
 0x18f   : > { %v668_v18 = vrot.slane %v667_v16, 4  ;;  %v691_v19 = vadd.f32 %v690_v17, %v684_v14 }
 0x191   : > { %v669_v20 = vadd.f32 %v668_v18, %v667_v16  ;;  %v692_v21 = vrot.slane %v691_v19, 4 }
 0x193   : > { %v670_v22 = vrot.slane %v669_v20, 2  ;;  %v693_v23 = vadd.f32 %v692_v21, %v691_v19 }
 0x195   : > { %v671_v24 = vadd.f32 %v670_v22, %v669_v20  ;;  %v694_v25 = vrot.slane %v693_v23, 2 }
 0x197   : > { %v672_v26 = vrot.slane %v671_v24, 1  ;;  %v695_v27 = vadd.f32 %v694_v25, %v693_v23 }
 0x199   : > { %v673_v29 = vadd.f32 %v672_v26, %v671_v24  ;;  %v696_v30 = vrot.slane %v695_v27, 1 }
 0x19b   : > { %v674_v32 = vadd.f32 %v673_v29, %v660_v28  ;;  %v697_v33 = vadd.f32 %v696_v30, %v695_v27 }
 0x19d   : > { %675 = vst [vmem:[%s1086_s6] sm:$0x1] %v674_v32  ;;  %v698_v34 = vadd.f32 %v697_v33, %v676_v31 }
 0x19f   : > { %699 = vst [vmem:[%s1087_s7] sm:$0x1] %v698_v34 }
 0x1a0 PF: > { %s19_s26 = sadd.s32 1, %s934_s26  }
 0x1a1   : > { %p16_p5 = scmp.ge.s32.totalorder %s19_s26, 6  }
 0x1a3   :  { %18 = sbr.rel (!%p16_p5) target bundleno = 2 (0x2), region = 96 }

</bundles_post_ra>
